<compile_context>
chip_gen: v7x
topology: tpu7x:2x2x1
jax: 0.10.0
libtpu: 0.0.40
codegen_flags: <defaults>
</compile_context>

<pallas_src>
import jax
import jax.numpy as jnp
from jax.experimental import pallas as pl
from jax.experimental.pallas import tpu as pltpu


# ----------------------------- Pallas kernel -------------------------------

def _qconv_kernel(xT_ref, wc_ref, ws_ref, o_ref):
    """xT_ref: (K, TM) angles (positions on lanes); wc/ws: (N, K); o_ref: (N, TM)."""
    x = xT_ref[...]
    acc = jnp.dot(wc_ref[...], jnp.cos(x), preferred_element_type=jnp.float32)
    acc = acc + jnp.dot(ws_ref[...], jnp.sin(x), preferred_element_type=jnp.float32)
    o_ref[...] = acc.astype(o_ref.dtype)


def _pick_tile_m(M, max_tile_m=1024):
    """Largest multiple of 128 (<= max_tile_m) that still leaves ~2+ grid steps."""
    tile = 128 * pl.cdiv(M, 2 * 128)        # aim for about two grid steps
    return int(max(128, min(max_tile_m, tile)))


def _qconv_matmul_T(xT, w_cos, w_sin, *, max_tile_m=1024):
    """xT: (K, M) f32 angles; w_cos/w_sin: (N, K) f32 -> out^T: (N, M) f32."""
    K, M = xT.shape
    N = w_cos.shape[0]
    tile_m = _pick_tile_m(M, max_tile_m)
    grid_m = pl.cdiv(M, tile_m)             # tail tile auto-masked; no pad copy

    return pl.pallas_call(
        _qconv_kernel,
        out_shape=jax.ShapeDtypeStruct((N, M), jnp.float32),
        grid_spec=pltpu.PrefetchScalarGridSpec(
            num_scalar_prefetch=0,
            grid=(grid_m,),
            in_specs=[
                pl.BlockSpec((K, tile_m), lambda i: (0, i)),   # lane-dense angles
                pl.BlockSpec((N, K), lambda i: (0, 0)),        # tiny constant weights
                pl.BlockSpec((N, K), lambda i: (0, 0)),
            ],
            out_specs=pl.BlockSpec((N, tile_m), lambda i: (0, i)),   # lane-dense out
        ),
        compiler_params=pltpu.CompilerParams(
            dimension_semantics=("parallel",)),
    )(xT, w_cos, w_sin)


# ------------------------------- Module glue --------------------------------

class QuantumConvLayerPallas:
    """Classical-surrogate forward of QuantumConvLayer with a Pallas hot path."""

    def __init__(self, in_channels, out_channels, kernel_size,
                 stride=1, padding=0, *, key):
        if isinstance(kernel_size, int):
            kernel_size = (kernel_size, kernel_size)
        self.in_channels = in_channels
        self.out_channels = out_channels
        self.kernel_size = kernel_size
        self.stride = stride
        self.padding = padding
        self.n_qubits = in_channels * kernel_size[0] * kernel_size[1]
        n_params = out_channels * self.n_qubits * 3
        # torch.randn(n_params) equivalent, deterministic.
        self.params = jax.random.normal(key, (n_params,), dtype=jnp.float32)

    def _rotation_weights(self):
        p = self.params.reshape(self.out_channels, self.n_qubits, 3)
        rx, ry = p[..., 0], p[..., 1]          # rz does not affect <Z>
        w_cos = (jnp.cos(rx) * jnp.cos(ry)) / self.n_qubits   # (N, K)
        w_sin = (-jnp.sin(ry)) / self.n_qubits                 # (N, K)
        return w_cos.astype(jnp.float32), w_sin.astype(jnp.float32)

    def __call__(self, x):
        B, C, H, W = x.shape
        kh, kw = self.kernel_size
        # Patch extraction, replicating the reference module exactly: pad first, but
        # bound the sliding window by the ORIGINAL H/W (as the PyTorch loop does,
        # even when padding > 0 — replicated reference behavior).
        if self.padding > 0:
            x = jnp.pad(x, ((0, 0), (0, 0),
                            (self.padding, self.padding),
                            (self.padding, self.padding)))
        out_h = (H - kh) // self.stride + 1
        out_w = (W - kw) // self.stride + 1
        patches = jax.lax.conv_general_dilated_patches(
            x.astype(jnp.float32),
            filter_shape=(kh, kw),
            window_strides=(self.stride, self.stride),
            padding="VALID")                       # (B, C*kh*kw, oh_full, ow_full)
        patches = patches[:, :, :out_h, :out_w]    # original-H/W loop bound
        K = self.n_qubits
        P = out_h * out_w
        # Lane-dense transposed layout: (K, B*P) with positions on the lane axis.
        # TODO(synk): for large images, extract patches inside the kernel (image in
        #             HBM + per-tile window DMA) to avoid materializing the ~kh*kw x
        #             inflated im2col matrix in HBM at all.
        xT = patches.reshape(B, K, P).transpose(1, 0, 2).reshape(K, B * P)
        w_cos, w_sin = self._rotation_weights()
        outT = _qconv_matmul_T(xT, w_cos, w_sin)             # (N, B*P)
        out = outT.reshape(self.out_channels, B, P).transpose(1, 0, 2)
        # (batch, out_channels, out_h*out_w), matching .view(B, C_out, -1)
        return out


# ------------------------- reference-only utilities --------------------------

def _sliding_window_ref(x, kernel_size, stride, padding):
    """Literal replication of QuantumConvLayer._sliding_window (for checking)."""
    B, C, H, W = x.shape
    kh, kw = kernel_size
    if padding > 0:
        x = jnp.pad(x, ((0, 0), (0, 0), (padding, padding), (padding, padding)))
    patches = []
    for i in range(0, H - kh + 1, stride):
        for j in range(0, W - kw + 1, stride):
            patches.append(x[:, :, i:i + kh, j:j + kw])
    return jnp.stack(patches, axis=1)  # (B, P, C, kh, kw)


# ----------------------------------- main ------------------------------------

if __name__ == "__main__":
    key = jax.random.PRNGKey(0)
    k_param, k_x = jax.random.split(key)

    B, C, H, W = 2, 4, 16, 16
    out_channels, kernel_size, stride, padding = 8, 3, 1, 0

    layer = QuantumConvLayerPallas(C, out_channels, kernel_size,
                                   stride=stride, padding=padding, key=k_param)
    x = jax.random.normal(k_x, (B, C, H, W), dtype=jnp.float32)

    y = layer(x)
    y = jax.block_until_ready(y)

    out_h = (H - kernel_size) // stride + 1
    out_w = (W - kernel_size) // stride + 1
    assert y.shape == (B, out_channels, out_h * out_w), y.shape
    assert bool(jnp.all(jnp.isfinite(y)))

    # Pure-JAX reference of the surrogate math using the literal (PyTorch-style)
    # patch loop — also validates the conv_general_dilated_patches ordering and
    # the transposed/lane-dense kernel formulation.
    patches = _sliding_window_ref(x, (kernel_size, kernel_size), stride, padding)
    xf = patches.reshape(B * out_h * out_w, layer.n_qubits)
    wc, ws = layer._rotation_weights()                  # (N, K)
    ref = jnp.cos(xf) @ wc.T + jnp.sin(xf) @ ws.T       # (B*P, N)
    ref = jnp.transpose(ref.reshape(B, out_h * out_w, out_channels), (0, 2, 1))
    assert jnp.allclose(y, ref, atol=2e-5, rtol=2e-5), \
        float(jnp.max(jnp.abs(y - ref)))

    print("KERNEL_OK")
</pallas_src>

<mosaic_0001>
module attributes {stable_mosaic.version = 11 : i64} {
  func.func @_qconv_kernel(%arg0: i32, %arg1: memref<36x256xf32, #tpu.memory_space<vmem>>, %arg2: memref<8x36xf32, #tpu.memory_space<vmem>>, %arg3: memref<8x36xf32, #tpu.memory_space<vmem>>, %arg4: memref<8x256xf32, #tpu.memory_space<vmem>>) attributes {dimension_semantics = [#tpu.dimension_semantics<parallel>], iteration_bounds = array<i64: 2>, scalar_prefetch = 0 : i64, scratch_operands = 0 : i64, tpu.core_type = #tpu.core_type<tc>, window_params = [{transform_indices = @transform_0, window_bounds = array<i64: 36, 256>}, {pipeline_mode = #tpu.pipeline_mode<synchronous>, transform_indices = @transform_1, window_bounds = array<i64: 8, 36>}, {pipeline_mode = #tpu.pipeline_mode<synchronous>, transform_indices = @transform_2, window_bounds = array<i64: 8, 36>}, {transform_indices = @transform_3, window_bounds = array<i64: 8, 256>}]} {
    %c0 = arith.constant 0 : index
    %c0_0 = arith.constant 0 : index
    %0 = vector.load %arg1[%c0, %c0_0] : memref<36x256xf32, #tpu.memory_space<vmem>>, vector<36x256xf32>
    %c0_1 = arith.constant 0 : index
    %c0_2 = arith.constant 0 : index
    %1 = vector.load %arg2[%c0_1, %c0_2] : memref<8x36xf32, #tpu.memory_space<vmem>>, vector<8x36xf32>
    %2 = math.cos %0 : vector<36x256xf32>
    %cst = arith.constant dense<0.000000e+00> : vector<8x256xf32>
    %3 = tpu.matmul %1, %2, %cst {dimension_numbers = #tpu.dot_dimension_numbers<[1], [0], [0], [1], [0, 0, 1, 1], [], []>} : vector<8x36xf32>, vector<36x256xf32>, vector<8x256xf32> -> vector<8x256xf32>
    %c0_3 = arith.constant 0 : index
    %c0_4 = arith.constant 0 : index
    %4 = vector.load %arg3[%c0_3, %c0_4] : memref<8x36xf32, #tpu.memory_space<vmem>>, vector<8x36xf32>
    %5 = math.sin %0 : vector<36x256xf32>
    %cst_5 = arith.constant dense<0.000000e+00> : vector<8x256xf32>
    %6 = tpu.matmul %4, %5, %cst_5 {dimension_numbers = #tpu.dot_dimension_numbers<[1], [0], [0], [1], [0, 0, 1, 1], [], []>} : vector<8x36xf32>, vector<36x256xf32>, vector<8x256xf32> -> vector<8x256xf32>
    %7 = arith.addf %3, %6 : vector<8x256xf32>
    %c0_6 = arith.constant 0 : index
    %c0_7 = arith.constant 0 : index
    %8 = vector.load %arg4[%c0_6, %c0_7] : memref<8x256xf32, #tpu.memory_space<vmem>>, vector<8x256xf32>
    tpu.vector_store %arg4[%c0_6, %c0_7], %7 {strides = array<i32>} : memref<8x256xf32, #tpu.memory_space<vmem>>, vector<8x256xf32>,
    return
  }
  func.func @transform_0(%arg0: i32) -> (i32, i32) {
    %c0_i32 = arith.constant 0 : i32
    %c0_i32_0 = arith.constant 0 : i32
    return %c0_i32, %arg0 : i32, i32
  }
  func.func @transform_1(%arg0: i32) -> (i32, i32) {
    %c0_i32 = arith.constant 0 : i32
    %c0_i32_0 = arith.constant 0 : i32
    %c0_i32_1 = arith.constant 0 : i32
    return %c0_i32, %c0_i32_0 : i32, i32
  }
  func.func @transform_2(%arg0: i32) -> (i32, i32) {
    %c0_i32 = arith.constant 0 : i32
    %c0_i32_0 = arith.constant 0 : i32
    %c0_i32_1 = arith.constant 0 : i32
    return %c0_i32, %c0_i32_0 : i32, i32
  }
  func.func @transform_3(%arg0: i32) -> (i32, i32) {
    %c0_i32 = arith.constant 0 : i32
    %c0_i32_0 = arith.constant 0 : i32
    return %c0_i32, %arg0 : i32, i32
  }
}

</mosaic_0001>

<bundles_post_ra>
// kernel: tpu_custom_call.1
= control target key start
LH: loop header
LB: loop body
LE: loop exit
PB: predicated region body
PF: predicated region fallthrough
CT: control target
= control target key end

     0   :  { %8 = vsyncpa [#allocation3], 0  ;;  %s4274_s0 = inlined_call_operand.hbm [shape: f32[36,392], index: 0, kind: input, shape index: {}]   ;;  %s4275_s1 = inlined_call_operand.hbm [shape: f32[8,36], index: 1, kind: input, shape index: {}]   ;;  %s4276_s2 = inlined_call_operand.hbm [shape: f32[8,36], index: 2, kind: input, shape index: {}]   ;;  %s4277_s3 = inlined_call_operand.hbm [shape: f32[8,392], index: 3, kind: output, shape index: {}]  }
   0x1   :  { %10 = vsyncpa [#allocation3 + $0x1], 0 }
   0x2   :  { %11 = vsyncpa [#allocation6], 0 }
   0x3   :  { %12 = vsyncpa [#allocation4], 0 }
   0x4   :  { %14 = vsyncpa [#allocation4 + $0x1], 0  ;;  %s3039_s12 = smov 0   ;;  %s3041_s13 = smov 0  }
   0x5   :  { %s3043_s14 = smov 0   ;;  %s3045_s15 = smov 0  }
   0x6 LB: > { %s3060_s16 = sadd.s32 4294967295, %s3003_s15   ;;  %s2566_s17 = sadd.s32 4294967294, %s3003_s15   ;;  %s3003_s15 = sphi %s3045_s15, %s4318_s15   ;;  %s2999_s14 = sphi %s3043_s14, %s4317_s14   ;;  %s2995_s13 = sphi %s3041_s13, %s4316_s13   ;;  %s2991_s12 = sphi %s3039_s12, %s4315_s12  }
   0x7   : > { %s3064_s18 = sadd.s32 1, %s3003_s15   ;;  %s27_s19 = sadd.s32 1, %s2999_s14 }
   0x8   : > { %s24_s20 = ssub.s32 %s3003_s15, %s3064_s18  ;;  %p34_p0 = scmp.ne.s32.totalorder %s2999_s14, %s2995_s13 }
   0x9   : > { %p25_p1 = scmp.eq.s32.totalorder %s24_s20, 0  ;;  %p35_p2 = scmp.eq.s32.totalorder %s3003_s15, 0 }
   0xa   : > { %p40_p3 = scmp.ne.s32.totalorder %s2995_s13, %s2991_s12  ;;  %p4278_p4 = scmp.eq.s32.totalorder %s3060_s16, 0 }
   0xb   : > { %s3076_s21 = scalar_select %p25_p1, %s2999_s14, %s27_s19  }
   0xc   : > { %p3078_p5 = por %p35_p2, %p34_p0  ;;  %p3084_p6 = por %p4278_p4, %p40_p3 }
   0xd   : > { %p106_p7 = scmp.eq.s32.totalorder %s3060_s16, 1  ;;  %p112_p8 = scmp.eq.s32.totalorder %s2566_s17, 1 }
   0xe   : > { %s4284_s23 = scalar_select %p3084_p6, 1, 0 }
   0xf   : > { %p2567_p9 = scmp.ge.s32.totalorder %s3003_s15, 1  ;;  %p119_p10 = scmp.lt.s32.totalorder %s3003_s15, 3 }
  0x10   : > { %p3091_p11 = por %p106_p7, %p34_p0  ;;  %p3095_p12 = por %p112_p8, %p40_p3 }
  0x11   : > { %p3099_p13 = pnand %p2567_p9, %p119_p10  ;;  %s3005_s27 = smov [#allocation5]  }
  0x12   : > { %s4285_s24 = scalar_select %p3091_p11, 1, 0 }
  0x13   : > { %s4286_s25 = scalar_select %p3095_p12, 1, 0 }
  0x14   : > { %s4287_s26 = scalar_select %p3099_p13, 1, 0 }
  0x15   : > { %p2742_p2 = pneg %p3099_p13  ;;  %s132_s28 = sshll.u32 %s3005_s27, 4  ;;  %s133_s28 = int_to_ptr.vmem [resolvable:$true] %s132_s28 }
  0x16   : > { %p2759_p4 = scmp.lt.s32.totalorder %s3003_s15, 2  ;;  %p4288_p0 = scmp.eq.s32.totalorder %s3060_s16, 0 }
  0x17   : > { %s3006_s4 = smov [#allocation7]   ;;  %s2847_s8 = scalar_lea.hbm %s4275_s1, 128 }
  0x18   : > { %p3109_p7 = pnand %p2742_p2, %p4288_p0  ;;  %p3115_p3 = pnand %p2759_p4, %p3078_p5 }
  0x19   : > { %s143_s5 = sshll.u32 %s3006_s4, 4  ;;  %p2848_p8 = scmp.ne.s32.totalorder %s4275_s1, %s2847_s8  ;;  %s3119_s5 = int_to_ptr.vmem [resolvable:$true] %s143_s5 }
  0x1a   : > { %s4290_s30 = scalar_select %p3115_p3, 1, 0 }
  0x1b   : > { %p2849_p9 = pneg %p3109_p7  ;;  %p2854_p10 = scmp.lt.u32.totalorder %s2847_s8, %s4275_s1 }
  0x1d   : > { %p2850_p4 = pnand %p2849_p9, %p2848_p8 }
  0x1f   : > { %p2851_p5 = pneg %p2850_p4 }
  0x21   : > { %p2856_p2 = pnand %p2854_p10, %p2851_p5 }
  0x23   : > { %2859 = shalt.err (!%p2856_p2)
}
  0x24   : > { %s2860_s19 = scalar_lea.vmem %s133_s28, 128  ;;  %p2868_p11 = scmp.lt.s32.totalorder %s133_s28, %s133_s28 }
  0x25   : > { %p2861_p0 = scmp.ne.s32.totalorder %s133_s28, %s2860_s19  ;;  %p2869_p6 = scmp.lt.s32.totalorder %s2860_s19, %s2860_s19 }
  0x27   : > { %p2863_p1 = pnand %p2861_p0, %p2849_p9  ;;  %p2870_p13 = por %p2869_p6, %p2868_p11 }
  0x29   : > { %p2864_p12 = pneg %p2863_p1 }
  0x2b   : > { %p2871_p3 = pnand %p2870_p13, %p2864_p12 }
  0x2d   : > { %2874 = shalt.err (!%p2871_p3)
}
  0x2e   : > { %2745 = dma.hbm_to_vmem [thread:$0]  (!%p3109_p7), %s4275_s1, 128, %s133_s28, [#allocation6]  }
  0x2f   : > { %s154_s27 = sand.u32 1, %s2999_s14   ;;  %s2875_s7 = scalar_lea.hbm %s4276_s2, 128 }
  0x30   : > { %p2876_p1 = scmp.ne.s32.totalorder %s4276_s2, %s2875_s7  ;;  %p2882_p12 = scmp.lt.u32.totalorder %s2875_s7, %s4276_s2 }
  0x32   : > { %p2878_p6 = pnand %p2876_p1, %p2849_p9 }
  0x34   : > { %p2879_p11 = pneg %p2878_p6 }
  0x36   : > { %p2884_p13 = pnand %p2882_p12, %p2879_p11 }
  0x38   : > { %2887 = shalt.err (!%p2884_p13)
}
  0x39   : > { %s2888_s28 = scalar_lea.vmem %s3119_s5, 128  ;;  %p2896_p5 = scmp.lt.s32.totalorder %s3119_s5, %s3119_s5 }
  0x3a   : > { %p2889_p3 = scmp.ne.s32.totalorder %s3119_s5, %s2888_s28  ;;  %p2897_p10 = scmp.lt.s32.totalorder %s2888_s28, %s2888_s28 }
  0x3c   : > { %p2891_p8 = pnand %p2889_p3, %p2849_p9  ;;  %p2898_p2 = por %p2897_p10, %p2896_p5 }
  0x3e   : > { %p2892_p4 = pneg %p2891_p8 }
  0x40   : > { %p2899_p0 = pnand %p2898_p2, %p2892_p4 }
  0x42   : > { %2902 = shalt.err (!%p2899_p0)
}
  0x43   : > { %2748 = dma.hbm_to_vmem [thread:$0]  (!%p3109_p7), %s4276_s2, 128, %s3119_s5, [#allocation6]  }
  0x44   : > { %s2688_s20 = smul.u32 80, %s154_s27  ;;  %s2668_s22 = sshll.u32 %s3003_s15, 8 }
  0x45   : > { %s3173_s7 = scalar_lea.hbm %s4274_s0, %s2668_s22  ;;  %s3177_s9 = scalar_lea.sflag [#allocation3], %s154_s27 }
  0x46   : > { %s158_s29 = scalar_lea.vmem [#allocation2], %s2688_s20  ;;  %s2903_s10 = scalar_lea.hbm %s3173_s7, 1280 }
  0x47   : > { %s165_s8 = sshll.u32 %s158_s29, 4  ;;  %p2904_p9 = scmp.ne.s32.totalorder %s3173_s7, %s2903_s10  ;;  %s3175_s8 = int_to_ptr.vmem [resolvable:$true] %s165_s8 }
  0x48   : > { %p4291_p7 = scmp.ne.s32.totalorder %s4290_s30, 0  ;;  %s2908_s28 = scalar_lea.hbm %s4274_s0, 2560 }
  0x49   : > { %p2909_p12 = scmp.lt.u32.totalorder %s3173_s7, %s4274_s0  ;;  %p2910_p13 = scmp.lt.u32.totalorder %s2908_s28, %s2903_s10 }
  0x4a   : > { %p2905_p1 = pneg %p4291_p7  ;;  %p2912_p8 = scmp.lt.u32.totalorder %s2903_s10, %s3173_s7 }
  0x4b   : > { %p2911_p3 = por %p2910_p13, %p2909_p12 }
  0x4c   : > { %p2906_p6 = pnand %p2905_p1, %p2904_p9 }
  0x4d   : > { %p2913_p4 = por %p2912_p8, %p2911_p3 }
  0x4e   : > { %p2907_p11 = pneg %p2906_p6 }
  0x50   : > { %p2914_p5 = pnand %p2913_p4, %p2907_p11 }
  0x52   : > { %2917 = shalt.err (!%p2914_p5)
}
  0x53   : > { %s2918_s27 = scalar_lea.vmem %s3175_s8, 1280  ;;  %s3007_s20 = smov [#allocation2]  }
  0x54   : > { %p2919_p10 = scmp.ne.s32.totalorder %s3175_s8, %s2918_s27  ;;  %s2923_s22 = sshll.u32 %s3007_s20, 4  ;;  %s2924_s22 = int_to_ptr.vmem [resolvable:$false] %s2923_s22 }
  0x55   : > { %s2925_s4 = scalar_lea.vmem %s2924_s22, 2560  ;;  %p2926_p9 = scmp.lt.s32.totalorder %s3175_s8, %s2924_s22 }
  0x56   : > { %p2921_p2 = pnand %p2919_p10, %p2905_p1  ;;  %p2927_p6 = scmp.lt.s32.totalorder %s2925_s4, %s2918_s27 }
  0x58   : > { %p2922_p0 = pneg %p2921_p2  ;;  %p2928_p12 = por %p2927_p6, %p2926_p9 }
  0x5a   : > { %p2929_p13 = pnand %p2928_p12, %p2922_p0 }
  0x5c   : > { %2932 = shalt.err (!%p2929_p13)
}
  0x5d   : > { %s3008_s6 = smov 512   ;;  %s3009_s29 = smov 256  }
  0x5e   : > { %s3010_s10 = smov 16   ;;  %p4292_p1 = scmp.ne.s32.totalorder %s4287_s26, 0 }
  0x5f   : > { %2752 = dma.hbm_to_vmem [thread:$0]  (!%p4291_p7), %s3173_s7, 1280, %s3175_s8, %s3177_s9, %s3008_s6, %s3009_s29, %s3010_s10  }
  0x60   : > { %177 = sbr.rel (%p4292_p1) target bundleno = 638 (0x27e), region = 32  ;;  %s3208_s5 = sand.u32 (!%p4292_p1), 1, %s2995_s13  }
  0x61   : > { %s2689_s11 = smul.u32 (!%p4292_p1), 80, %s3208_s5  ;;  %s180_s28 = scalar_lea.sflag (!%p4292_p1), [#allocation3], %s3208_s5 }
  0x62   : > { %p4293_p11 = scmp.ne.s32.totalorder (!%p4292_p1), %s4284_s23, 0 }
  0x63   : > { %s3212_s17 = scalar_lea.vmem (!%p4292_p1), [#allocation2], %s2689_s11 }
  0x67   : > { %2978 = dma.done.wait (%p4293_p11), %s180_s28, 1280  }
  0x68   : > { %2980 = vsyncadd (%p4293_p11), %s180_s28, 4294966016  ;;  %p4294_p7 = scmp.eq.s32.totalorder %s3060_s16, 0 }
  0x6a   : > { %2982 = dma.done.wait (%p4294_p7), [#allocation6], 256   ;;  %p4295_p3 = pmov %p4294_p7 }
  0x6b   : > { %v3223_v0 = vld [vmem:[%s3212_s17 + $0x8] sm:$0xff]  ;;  %v3226_v1 = vld [vmem:[%s3212_s17 + $0x18] sm:$0xff]  ;;  %v3231_v4 = vld [vmem:[%s3212_s17] sm:$0xff]  ;;  %v3011_v30 = vmov 683565275   ;;  %s2576_s23 = sshll.u32 %s3208_s5, 4 }
  0x6c   : > { %2984 = vsyncadd (%p4295_p3), [#allocation6], 4294967040  ;;  %v330_v2 = vand.u32 2147483647, %v3223_v0  ;;  %v333_v3 = vand.u32 2139095040, %v3223_v0  ;;  %v539_v6 = vand.u32 2139095040, %v3226_v1 }
  0x6d   : > { %v536_v5 = vand.u32 2147483647, %v3226_v1  ;;  %v230_v11 = vand.u32 2139095040, %v3231_v4  ;;  %v227_v24 = vand.u32 2147483647, %v3231_v4  ;;  %vm332_vm13 = vcmp.lt.s32.totalorder %v3223_v0, 0 }
  0x6e   : > { %v334_v7 = vshrl.u32 %v333_v3, 23  ;;  %v337_v8 = vand.u32 8388607, %v330_v2  ;;  %v540_v9 = vshrl.u32 %v539_v6, 23  ;;  %v3012_v32 = vmov 2475754826  }
  0x6f   : > { %v543_v10 = vand.u32 8388607, %v536_v5  ;;  %v231_v14 = vshrl.u32 %v230_v11, 23  ;;  %v3013_v34 = vmov 2131351028   ;;  %s2669_s26 = sshll.u32 %s3060_s16, 8 }
  0x70   : > { %v2581_v12 = vadd.s32 4294967169, %v334_v7  ;;  %v2589_v13 = vadd.s32 4294967169, %v540_v9  ;;  %v338_v16 = vor.u32 8388608, %v337_v8  ;;  %v3014_v36 = vmov 2102212464   ;;  %s213_s30 = scalar_lea.vmem [#allocation8], %s2576_s23  ;;  %s4230_s19 = scalar_lea.hbm %s4277_s3, %s2669_s26 }
  0x71   : > { %v544_v17 = vor.u32 8388608, %v543_v10  ;;  %v2577_v19 = vadd.s32 4294967169, %v231_v14  ;;  %v3015_v38 = vmov 920167782   ;;  %v3016_v46 = vmov 1326507024  }
  0x72   : > { %v340_v15 = vadd.s32 1, %v2581_v12  ;;  %v546_v18 = vadd.s32 1, %v2589_v13  ;;  %v3241_v25 = vshll.u32 %v338_v16, 8  ;;  %vm3334_vm14 = vcmp.le.f32.partialorder %v330_v2, 0.7853982  ;;  %s2477_s7 = sshll.u32 %s213_s30, 4  ;;  %s4232_s7 = int_to_ptr.vmem [resolvable:$true] %s2477_s7 }
  0x73   : > { %v3243_v27 = vshll.u32 %v544_v17, 8  ;;  %v3245_v28 = vadd.s32 1, %v2577_v19  ;;  %s2463_s16 = scalar_lea.sflag [#allocation4], %s3208_s5  ;;  %s2933_s27 = scalar_lea.vmem %s4232_s7, 256 }
  0x74   : > { %vm341_vm0 = vcmp.gt.s32.totalorder %v340_v15, 0  ;;  %vm547_vm1 = vcmp.gt.s32.totalorder %v546_v18, 0  ;;  %p2934_p8 = scmp.ne.s32.totalorder %s4232_s7, %s2933_s27  ;;  %p4312_p4 = scmp.ne.s32.totalorder %s4285_s24, 0 }
  0x75   : > { %v342_v20 = vsel %vm341_vm0, %v340_v15, 0  ;;  %v548_v23 = vsel %vm547_vm1, %v546_v18, 0  ;;  %vm238_vm6 = vcmp.gt.s32.totalorder %v3245_v28, 0  ;;  %s3018_s20 = smov [#allocation8]  }
  0x76   : > { %v343_v21 = vshrl.u32 %v342_v20, 5  ;;  %v344_v22 = vand.u32 31, %v342_v20  ;;  %v550_v26 = vand.u32 31, %v548_v23  ;;  %v3252_v40 = vshrl.u32 %v548_v23, 5  ;;  %p2935_p5 = pnand %p2934_p8, %p4312_p4  ;;  %s2937_s22 = sshll.u32 %s3018_s20, 4  ;;  %s2938_s22 = int_to_ptr.vmem [resolvable:$false] %s2937_s22 }
  0x77   : > { %s2939_s4 = scalar_lea.vmem %s2938_s22, 512  ;;  %p2940_p2 = scmp.lt.s32.totalorder %s4232_s7, %s2938_s22 }
  0x78   : > { %v345_v29 = vsub.s32 32, %v344_v22  ;;  %v347_v31 = vshll.u32 %v3011_v30, %v344_v22  ;;  %v350_v33 = vshll.u32 %v3012_v32, %v344_v22  ;;  %v353_v35 = vshll.u32 %v3013_v34, %v344_v22  ;;  %p2936_p10 = pneg %p2935_p5  ;;  %p2941_p0 = scmp.lt.s32.totalorder %s2939_s4, %s2933_s27 }
  0x79   : > { %v356_v37 = vshll.u32 %v3014_v36, %v344_v22  ;;  %v359_v39 = vshll.u32 %v3015_v38, %v344_v22  ;;  %vm362_vm2 = vcmp.lt.s32.totalorder %v343_v21, 1  ;;  %vm363_vm3 = vcmp.lt.s32.totalorder %v343_v21, 2 }
  0x7a   : > { %v346_v41 = vshrl.u32 %v3011_v30, %v345_v29  ;;  %v348_v42 = vshrl.u32 %v3012_v32, %v345_v29  ;;  %v351_v43 = vshrl.u32 %v3013_v34, %v345_v29  ;;  %v354_v44 = vshrl.u32 %v3014_v36, %v345_v29  ;;  %p2942_p9 = por %p2941_p0, %p2940_p2 }
  0x7b   : > { %v357_v45 = vshrl.u32 %v3015_v38, %v345_v29  ;;  %v360_v47 = vshrl.u32 %v3016_v46, %v345_v29  ;;  %vm365_vm4 = vcmp.lt.s32.totalorder %v343_v21, 4  ;;  %v551_v51 = vsub.s32 32, %v550_v26 }
  0x7c   : > { %v349_v48 = vor.u32 %v348_v42, %v347_v31  ;;  %v352_v49 = vor.u32 %v351_v43, %v350_v33  ;;  %v355_v50 = vor.u32 %v354_v44, %v353_v35  ;;  %vm364_vm5 = vcmp.lt.s32.totalorder %v343_v21, 3  ;;  %p2943_p6 = pnand %p2942_p9, %p2936_p10 }
  0x7d   : > { %v358_v52 = vor.u32 %v357_v45, %v356_v37  ;;  %v361_v53 = vor.u32 %v360_v47, %v359_v39  ;;  %v553_v54 = vshll.u32 %v3011_v30, %v550_v26  ;;  %v556_v62 = vshll.u32 %v3012_v32, %v550_v26 }
  0x7e   : > { %v366_v55 = vsel %vm362_vm2, %v346_v41, %v349_v48  ;;  %v367_v56 = vsel %vm365_vm4, %v355_v50, 2102212464  ;;  %v370_v57 = vsel %vm362_vm2, %v349_v48, %v352_v49  ;;  %v374_v58 = vsel %vm362_vm2, %v352_v49, %v355_v50 }
  0x7f   : > { %v368_v59 = vsel %vm364_vm5, %v352_v49, %v367_v56  ;;  %v371_v60 = vsel %vm365_vm4, %v358_v52, 920167782  ;;  %v375_v61 = vsel %vm365_vm4, %v361_v53, 1326507024  ;;  %v552_v6 = vshrl.u32 %v3011_v30, %v551_v51 }
  0x80   : > { %v372_v63 = vsel %vm364_vm5, %v355_v50, %v371_v60  ;;  %v376_v3 = vsel %vm364_vm5, %v358_v52, %v375_v61  ;;  %v554_v7 = vshrl.u32 %v3012_v32, %v551_v51  ;;  %v369_v8 = vsel %vm363_vm3, %v366_v55, %v368_v59 }
  0x81   : > { %v373_v9 = vsel %vm363_vm3, %v370_v57, %v372_v63  ;;  %v377_v10 = vsel %vm363_vm3, %v374_v58, %v376_v3  ;;  %v557_v11 = vshrl.u32 %v3013_v34, %v551_v51  ;;  %v559_v18 = vshll.u32 %v3013_v34, %v550_v26  ;;  %v3309_v57 = vld [vmem:[%s3212_s17 + $0x10] sm:$0xff] }
  0x82   : > { %v3273_v12 = vmul.u32.u64.low %v3241_v25, %v377_v10  ;;  %v3274_v13 = vmul.u32.u64.high %v3241_v25, %v377_v10, %v3273_v12  ;;  %v3277_v14 = vmul.u32.u64.low %v3241_v25, %v373_v9  ;;  %v3278_v15 = vmul.u32.u64.high %v3241_v25, %v373_v9, %v3277_v14 }
  0x83   : > { %v555_v16 = vor.u32 %v554_v7, %v553_v54  ;;  %v558_v17 = vor.u32 %v557_v11, %v556_v62  ;;  %v560_v19 = vshrl.u32 %v3014_v36, %v551_v51  ;;  %v562_v20 = vshll.u32 %v3014_v36, %v550_v26 }
  0x84   : > { %v563_v21 = vshrl.u32 %v3015_v38, %v551_v51  ;;  %v565_v22 = vshll.u32 %v3015_v38, %v550_v26  ;;  %v566_v23 = vshrl.u32 %v3016_v46, %v551_v51  ;;  %v385_v29 = vmul.u32 %v3241_v25, %v369_v8 }
  0x85   : > { %v561_v31 = vor.u32 %v560_v19, %v559_v18  ;;  %vm568_vm7 = vcmp.lt.s32.totalorder %v3252_v40, 1  ;;  %vm569_vm8 = vcmp.lt.s32.totalorder %v3252_v40, 2  ;;  %vm387_vm9 = vc.u32 %v3274_v13, %v3277_v14 }
  0x86   : > { %v388_v33 = vadd.s32 1, %v3278_v15  ;;  %v564_v35 = vor.u32 %v563_v21, %v562_v20  ;;  %vm570_vm10 = vcmp.lt.s32.totalorder %v3252_v40, 3  ;;  %v567_v37 = vor.u32 %v566_v23, %v565_v22 }
  0x87   : > { %vm571_vm11 = vcmp.lt.s32.totalorder %v3252_v40, 4  ;;  %v572_v26 = vsel %vm568_vm7, %v552_v6, %v555_v16  ;;  %v576_v39 = vsel %vm568_vm7, %v555_v16, %v558_v17  ;;  %v580_v43 = vsel %vm568_vm7, %v558_v17, %v561_v31 }
  0x88   : > { %v389_v25 = vsel %vm387_vm9, %v388_v33, %v3278_v15  ;;  %v573_v41 = vsel %vm571_vm11, %v561_v31, 2102212464  ;;  %v577_v42 = vsel %vm571_vm11, %v564_v35, 920167782  ;;  %v581_v48 = vsel %vm571_vm11, %v567_v37, 1326507024 }
  0x89   : > { %v390_v44 = vadd.s32 %v389_v25, %v385_v29  ;;  %v574_v45 = vsel %vm570_vm10, %v558_v17, %v573_v41  ;;  %v578_v47 = vsel %vm570_vm10, %v561_v31, %v577_v42  ;;  %v582_v51 = vsel %vm570_vm10, %v564_v35, %v581_v48 }
  0x8a   : > { %v575_v49 = vsel %vm569_vm8, %v572_v26, %v574_v45  ;;  %v579_v50 = vsel %vm569_vm8, %v576_v39, %v578_v47  ;;  %v239_v52 = vsel %vm238_vm6, %v3245_v28, 0  ;;  %v583_v54 = vsel %vm569_vm8, %v580_v43, %v582_v51 }
  0x8b   : > { %v391_v53 = vadd.s32 536870912, %v390_v44  ;;  %v3304_v55 = vmul.u32.u64.low %v3243_v27, %v579_v50  ;;  %v3305_v56 = vmul.u32.u64.high %v3243_v27, %v579_v50, %v3304_v55  ;;  %v234_v60 = vand.u32 8388607, %v227_v24 }
  0x8c   : > { %v3312_v58 = vmul.u32.u64.low %v3243_v27, %v583_v54  ;;  %v3313_v59 = vmul.u32.u64.high %v3243_v27, %v583_v54, %v3312_v58  ;;  %v241_v28 = vand.u32 31, %v239_v52  ;;  %v591_v62 = vmul.u32 %v3243_v27, %v575_v49 }
  0x8d   : > { %v392_v61 = vshrl.u32 %v391_v53, 30  ;;  %v436_v40 = vand.u32 2139095040, %v3309_v57  ;;  %v594_v3 = vadd.s32 1, %v3305_v56  ;;  %v433_v6 = vand.u32 2147483647, %v3309_v57 }
  0x8e   : > { %vm593_vm12 = vc.u32 %v3313_v59, %v3304_v55  ;;  %v235_v7 = vor.u32 8388608, %v234_v60  ;;  %v242_v10 = vsub.s32 32, %v241_v28  ;;  %v386_v17 = vadd.s32 %v3277_v14, %v3274_v13 }
  0x8f   : > { %v393_v63 = vshll.u32 %v392_v61, 30  ;;  %v595_v9 = vsel %vm593_vm12, %v594_v3, %v3305_v56  ;;  %v437_v12 = vshrl.u32 %v436_v40, 23  ;;  %v3330_v15 = vand.u32 8388607, %v433_v6 }
  0x90   : > { %v596_v11 = vadd.s32 %v595_v9, %v591_v62  ;;  %v3339_v19 = vshrl.u32 %v239_v52, 5  ;;  %v3341_v20 = vshll.u32 %v235_v7, 8  ;;  %v416_v22 = vsub.s32 4, %v392_v61 }
  0x91   : > { %v3323_v8 = vsub.s32 %v390_v44, %v393_v63  ;;  %v250_v23 = vshll.u32 %v3013_v34, %v241_v28  ;;  %v251_v29 = vshrl.u32 %v3014_v36, %v242_v10  ;;  %v244_v2 = vshll.u32 %v3011_v30, %v241_v28 }
  0x92   : > { %v597_v18 = vadd.s32 536870912, %v596_v11  ;;  %v245_v33 = vshrl.u32 %v3012_v32, %v242_v10  ;;  %v2585_v35 = vadd.s32 4294967169, %v437_v12  ;;  %v247_v14 = vshll.u32 %v3012_v32, %v241_v28 }
  0x93   : > { %v396_v27 = vsub.s32 0, %v3323_v8  ;;  %v248_v37 = vshrl.u32 %v3013_v34, %v242_v10  ;;  %v253_v26 = vshll.u32 %v3014_v36, %v241_v28  ;;  %v254_v25 = vshrl.u32 %v3015_v38, %v242_v10 }
  0x94   : > { %v3346_v31 = vshrl.u32 %v597_v18, 30  ;;  %vm259_vm15 = vcmp.lt.s32.totalorder %v3339_v19, 1  ;;  %vm262_vm0 = vcmp.lt.s32.totalorder %v3339_v19, 4  ;;  %v417_v42 = vsel %vm332_vm13, %v416_v22, %v392_v61 }
  0x95   : > { %v2582_v21 = vmin.u32 %v396_v27, %v3323_v8  ;;  %v243_v43 = vshrl.u32 %v3011_v30, %v242_v10  ;;  %v252_v44 = vor.u32 %v251_v29, %v250_v23  ;;  %v246_v47 = vor.u32 %v245_v33, %v244_v2 }
  0x96   : > { %v599_v39 = vshll.u32 %v3346_v31, 30  ;;  %v256_v48 = vshll.u32 %v3015_v38, %v241_v28  ;;  %v257_v49 = vshrl.u32 %v3016_v46, %v242_v10  ;;  %v249_v50 = vor.u32 %v248_v37, %v247_v14 }
  0x97   : > { %v398_v13 = vclz %v2582_v21  ;;  %v255_v51 = vor.u32 %v254_v25, %v253_v26  ;;  %v264_v52 = vsel %vm262_vm0, %v252_v44, 2102212464  ;;  %vm260_vm2 = vcmp.lt.s32.totalorder %v3339_v19, 2 }
  0x98   : > { %v3360_v45 = vsub.s32 %v596_v11, %v599_v39  ;;  %vm261_vm3 = vcmp.lt.s32.totalorder %v3339_v19, 3  ;;  %v419_v61 = vsel %vm3334_vm14, 0, %v417_v42  ;;  %v258_v62 = vor.u32 %v257_v49, %v256_v48 }
  0x99   : > { %v2583_v41 = vadd.s32 4294967294, %v398_v13  ;;  %v263_v40 = vsel %vm259_vm15, %v243_v43, %v246_v47  ;;  %v265_v63 = vsel %vm261_vm3, %v249_v50, %v264_v52  ;;  %vm538_vm4 = vcmp.lt.s32.totalorder %v3226_v1, 0 }
  0x9a   : > { %v602_v54 = vsub.s32 0, %v3360_v45  ;;  %v268_v9 = vsel %vm262_vm0, %v255_v51, 920167782  ;;  %v592_v10 = vadd.s32 %v3304_v55, %v3313_v59  ;;  %v622_v12 = vsub.s32 4, %v3346_v31 }
  0x9b   : > { %vm2584_vm1 = vcmp.lt.s32.totalorder %v2583_v41, 0  ;;  %v1455_v27 = vadd.s32 3, %v419_v61  ;;  %v271_v22 = vsel %vm259_vm15, %v249_v50, %v252_v44  ;;  %vm3391_vm5 = vcmp.le.f32.partialorder %v536_v5, 0.7853982 }
  0x9c   : > { %v401_v53 = vsel %vm2584_vm1, 0, %v2583_v41  ;;  %v2590_v28 = vmin.u32 %v602_v54, %v3360_v45  ;;  %v266_v55 = vsel %vm260_vm2, %v263_v40, %v265_v63  ;;  %v272_v2 = vsel %vm262_vm0, %v258_v62, 1326507024 }
  0x9d   : > { %v402_v56 = vsub.s32 32, %v401_v53  ;;  %v403_v58 = vshll.u32 %v3323_v8, %v401_v53  ;;  %v406_v60 = vsub.s32 4294967266, %v401_v53  ;;  %v267_v8 = vsel %vm259_vm15, %v246_v47, %v249_v50 }
  0x9e   : > { %v604_v11 = vclz %v2590_v28  ;;  %v273_v14 = vsel %vm261_vm3, %v255_v51, %v272_v2  ;;  %v443_v37 = vadd.s32 1, %v2585_v35  ;;  %v282_v19 = vmul.u32 %v3341_v20, %v266_v55 }
  0x9f   : > { %v404_v3 = vshrl.u32 %v386_v17, %v402_v56  ;;  %v407_v7 = vadd.s32 127, %v406_v60  ;;  %v269_v17 = vsel %vm261_vm3, %v252_v44, %v268_v9  ;;  %v274_v5 = vsel %vm260_vm2, %v271_v22, %v273_v14 }
  0xa0   : > { %v2591_v29 = vadd.s32 4294967294, %v604_v11  ;;  %v270_v59 = vsel %vm260_vm2, %v267_v8, %v269_v17  ;;  %v3411_v42 = vmul.u32.u64.low %v3341_v20, %v274_v5  ;;  %v3412_v43 = vmul.u32.u64.high %v3341_v20, %v274_v5, %v3411_v42 }
  0xa1   : > { %v405_v18 = vor.u32 %v404_v3, %v403_v58  ;;  %v408_v21 = vshll.u32 %v407_v7, 23  ;;  %v3406_v26 = vmul.u32.u64.low %v3341_v20, %v270_v59  ;;  %v3407_v39 = vmul.u32.u64.high %v3341_v20, %v270_v59, %v3406_v26 }
  0xa2   : > { %vm2592_vm6 = vcmp.lt.s32.totalorder %v2591_v29, 0  ;;  %vm444_vm7 = vcmp.gt.s32.totalorder %v443_v37, 0  ;;  %v441_v49 = vor.u32 8388608, %v3330_v15  ;;  %v623_v53 = vsel %vm538_vm4, %v622_v12, %v3346_v31 }
  0xa3   : > { %v409_v33 = vor.u32 4788187, %v408_v21  ;;  %v412_v13 = vcvt.s32.f32 %v405_v18  ;;  %v607_v41 = vsel %vm2592_vm6, 0, %v2591_v29  ;;  %v445_v50 = vsel %vm444_vm7, %v443_v37, 0 }
  0xa4   : > { %v608_v44 = vsub.s32 32, %v607_v41  ;;  %v609_v47 = vshll.u32 %v3360_v45, %v607_v41  ;;  %v612_v48 = vsub.s32 4294967266, %v607_v41  ;;  %v285_v54 = vadd.s32 1, %v3407_v39 }
  0xa5   : > { %v410_v25 = vand.u32 2147483647, %v409_v33  ;;  %v3421_v58 = vand.u32 3, %v419_v61  ;;  %vm284_vm8 = vc.u32 %v3412_v43, %v3406_v26  ;;  %v447_v45 = vand.u32 31, %v445_v50 }
  0xa6   : > { %v610_v51 = vshrl.u32 %v592_v10, %v608_v44  ;;  %v613_v52 = vadd.s32 127, %v612_v48  ;;  %v3425_v28 = vand.u32 3, %v1455_v27  ;;  %v286_v15 = vsel %vm284_vm8, %v285_v54, %v3407_v39 }
  0xa7   : > { %v413_v35 = vmul.f32 %v412_v13, %v410_v25  ;;  %v625_v31 = vsel %vm3391_vm5, 0, %v623_v53  ;;  %v287_v40 = vadd.s32 %v286_v15, %v282_v19  ;;  %v448_v63 = vsub.s32 32, %v447_v45 }
  0xa8   : > { %v611_v60 = vor.u32 %v610_v51, %v609_v47  ;;  %v614_v20 = vshll.u32 %v613_v52, 23  ;;  %v450_v8 = vshll.u32 %v3011_v30, %v447_v45  ;;  %v453_v11 = vshll.u32 %v3012_v32, %v447_v45 }
  0xa9   : > { %v414_v56 = vxor.u32 2147483648, %v413_v35  ;;  %v288_v9 = vadd.s32 536870912, %v287_v40  ;;  %v451_v10 = vshrl.u32 %v3012_v32, %v448_v63  ;;  %v454_v27 = vshrl.u32 %v3013_v34, %v448_v63 }
  0xaa   : > { %v615_v3 = vor.u32 4788187, %v614_v20  ;;  %v618_v7 = vcvt.s32.f32 %v611_v60  ;;  %v456_v18 = vshll.u32 %v3013_v34, %v447_v45  ;;  %v3442_v16 = vshrl.u32 %v445_v50, 5 }
  0xab   : > { %v415_v62 = vsel %vm332_vm13, %v414_v56, %v413_v35  ;;  %v3440_v21 = vshrl.u32 %v288_v9, 30  ;;  %v457_v17 = vshrl.u32 %v3014_v36, %v448_v63  ;;  %v459_v22 = vshll.u32 %v3014_v36, %v447_v45 }
  0xac   : > { %v418_v61 = vsel %vm3334_vm14, %v3223_v0, %v415_v62  ;;  %v616_v12 = vand.u32 2147483647, %v615_v3  ;;  %vm1458_vm9 = vcmp.eq.s32.totalorder %v3425_v28, 0  ;;  %v1663_v55 = vadd.s32 3, %v625_v31 }
  0xad   : > { %2807 = vcosq.f32 %v418_v61  ;;  %v460_v59 = vshrl.u32 %v3015_v38, %v448_v63  ;;  %v462_v2 = vshll.u32 %v3015_v38, %v447_v45  ;;  %v3449_v33 = vand.u32 3, %v625_v31 }
  0xae   : > { %2809 = vsinq.f32 %v418_v61  ;;  %v619_v29 = vmul.f32 %v618_v7, %v616_v12  ;;  %v290_v13 = vshll.u32 %v3440_v21, 30  ;;  %v452_v14 = vor.u32 %v451_v10, %v450_v8 }
  0xaf   : > { %v463_v37 = vshrl.u32 %v3016_v46, %v448_v63  ;;  %v455_v39 = vor.u32 %v454_v27, %v453_v11  ;;  %v458_v25 = vor.u32 %v457_v17, %v456_v18  ;;  %v461_v41 = vor.u32 %v460_v59, %v459_v22 }
  0xb0   : > { %v620_v5 = vxor.u32 2147483648, %v619_v29  ;;  %vm1457_vm10 = vcmp.lt.s32.totalorder %v3425_v28, 2  ;;  %vm425_vm11 = vcmp.eq.s32.totalorder %v3421_v58, 0  ;;  %vm428_vm12 = vcmp.eq.s32.totalorder %v3421_v58, 2 }
  0xb1   : > { %v3456_v42 = vsub.s32 %v287_v40, %v290_v13  ;;  %v464_v44 = vor.u32 %v463_v37, %v462_v2  ;;  %vm465_vm13 = vcmp.lt.s32.totalorder %v3442_v16, 1  ;;  %vm468_vm14 = vcmp.lt.s32.totalorder %v3442_v16, 4 }
  0xb2   : > { %v621_v47 = vsel %vm538_vm4, %v620_v5, %v619_v29  ;;  %v449_v48 = vshrl.u32 %v3011_v30, %v448_v63  ;;  %vm467_vm15 = vcmp.lt.s32.totalorder %v3442_v16, 3  ;;  %v3464_v35 = vshll.u32 %v441_v49, 8 }
  0xb3   : > { %v624_v19 = vsel %vm3391_vm5, %v3226_v1, %v621_v47  ;;  %v293_v50 = vsub.s32 0, %v3456_v42  ;;  %vm466_vm0 = vcmp.lt.s32.totalorder %v3442_v16, 2  ;;  %v470_v51 = vsel %vm468_vm14, %v458_v25, 2102212464 }
  0xb4   : > { %2811 = vcosq.f32 %v624_v19  ;;  %vm424_vm1 = vcmp.lt.s32.totalorder %v3421_v58, 2  ;;  %v473_v52 = vsel %vm465_vm13, %v452_v14, %v455_v39  ;;  %v474_v49 = vsel %vm468_vm14, %v461_v41, 920167782 }
  0xb5   : > { %v477_v23 = vsel %vm465_vm13, %v455_v39, %v458_v25  ;;  %vm422_vm2 = vweird.f32 %v3223_v0  ;;  %2813 = vsinq.f32 %v624_v19  ;;  %vm229_vm3 = vcmp.lt.s32.totalorder %v3231_v4, 0 }
  0xb6   : > { %v2578_v54 = vmin.u32 %v293_v50, %v3456_v42  ;;  %v475_v56 = vsel %vm467_vm15, %v458_v25, %v474_v49  ;;  %v478_v45 = vsel %vm468_vm14, %v464_v44, 1326507024  ;;  %vm1461_vm4 = vcmp.eq.s32.totalorder %v3425_v28, 2 }
  0xb7   : > { %v2808_v53 = vpop.eup %2807  ;;  %v1664_v15 = vand.u32 3, %v1663_v55  ;;  %v479_v62 = vsel %vm467_vm15, %v461_v41, %v478_v45  ;;  %vm631_vm5 = vcmp.eq.s32.totalorder %v3449_v33, 0  ;;  %v476_v63 = vsel %vm466_vm0, %v473_v52, %v475_v56 }
  0xb8   : > { %v2810_v60 = vpop.eup %2809  ;;  %v429_v20 = vxor.u32 2147483648, %v2808_v53  ;;  %v295_v40 = vclz %v2578_v54  ;;  %v480_v61 = vsel %vm466_vm0, %v477_v23, %v479_v62  ;;  %vm630_vm6 = vcmp.lt.s32.totalorder %v3449_v33, 2 }
  0xb9   : > { %v426_v31 = vxor.u32 2147483648, %v2810_v60  ;;  %v469_v3 = vsel %vm465_vm13, %v449_v48, %v452_v14  ;;  %v471_v7 = vsel %vm467_vm15, %v455_v39, %v470_v51  ;;  %vm628_vm7 = vweird.f32 %v3226_v1 }
  0xba   : > { %v3501_v8 = vmul.u32.u64.low %v3464_v35, %v480_v61  ;;  %v3502_v9 = vmul.u32.u64.high %v3464_v35, %v480_v61, %v3501_v8  ;;  %v1463_v11 = vsel %vm1461_vm4, %v429_v20, %v2810_v60  ;;  %vm634_vm8 = vcmp.eq.s32.totalorder %v3449_v33, 2 }
  0xbb   : > { %v1460_v10 = vsel %vm1458_vm9, %v2808_v53, %v426_v31  ;;  %v2579_v12 = vadd.s32 4294967294, %v295_v40  ;;  %vm1665_vm14 = vcmp.lt.s32.totalorder %v1664_v15, 2  ;;  %v313_v27 = vsub.s32 4, %v3440_v21 }
  0xbc   : > { %v3510_v18 = vmul.u32.u64.low %v3464_v35, %v476_v63  ;;  %v3511_v17 = vmul.u32.u64.high %v3464_v35, %v476_v63, %v3510_v18  ;;  %vm1666_vm13 = vcmp.eq.s32.totalorder %v1664_v15, 0  ;;  %v283_v22 = vadd.s32 %v3406_v26, %v3412_v43  ;;  %v3528_v26 = vld [vmem:[%s3212_s17 + $0x28] sm:$0xff] }
  0xbd   : > { %vm2580_vm15 = vcmp.lt.s32.totalorder %v2579_v12, 0  ;;  %v472_v29 = vsel %vm466_vm0, %v469_v3, %v471_v7  ;;  %v1464_v55 = vsel %vm1457_vm10, %v1460_v10, %v1463_v11  ;;  %v427_v59 = vsel %vm425_vm11, %v2808_v53, %v426_v31  ;;  %v3565_v10 = vld [vmem:[%s3212_s17 + $0x38] sm:$0xff] }
  0xbe   : > { %v430_v2 = vsel %vm428_vm12, %v429_v20, %v2810_v60  ;;  %v298_v13 = vsel %vm2580_vm15, 0, %v2579_v12  ;;  %vm490_vm9 = vc.u32 %v3502_v9, %v3510_v18  ;;  %v2812_v43 = vpop.eup %2811  ;;  %vm1669_vm0 = vcmp.eq.s32.totalorder %v1664_v15, 2 }
  0xbf   : > { %v299_v14 = vsub.s32 32, %v298_v13  ;;  %v300_v37 = vshll.u32 %v3456_v42, %v298_v13  ;;  %v303_v5 = vsub.s32 4294967266, %v298_v13  ;;  %v314_v28 = vsel %vm229_vm3, %v313_v27, %v3440_v21  ;;  %v2814_v25 = vpop.eup %2813 }
  0xc0   : > { %v488_v16 = vmul.u32 %v3464_v35, %v472_v29  ;;  %v491_v39 = vadd.s32 1, %v3511_v17  ;;  %v635_v41 = vxor.u32 2147483648, %v2812_v43  ;;  %v431_v42 = vsel %vm424_vm1, %v427_v59, %v430_v2 }
  0xc1   : > { %v301_v44 = vshrl.u32 %v283_v22, %v299_v14  ;;  %v304_v47 = vadd.s32 127, %v303_v5  ;;  %v632_v48 = vxor.u32 2147483648, %v2814_v25  ;;  %v1465_v19 = vsel %vm422_vm2, nan, %v1464_v55 }
  0xc2   : > { %v492_v50 = vsel %vm490_vm9, %v491_v39, %v3511_v17  ;;  %v745_v51 = vand.u32 2139095040, %v3528_v26  ;;  %v1671_v21 = vsel %vm1669_vm0, %v635_v41, %v2814_v25  ;;  %v636_v35 = vsel %vm634_vm8, %v635_v41, %v2814_v25 }
  0xc3   : > { %v302_v52 = vor.u32 %v301_v44, %v300_v37  ;;  %v305_v49 = vshll.u32 %v304_v47, 23  ;;  %v1668_v23 = vsel %vm1666_vm13, %v2812_v43, %v632_v48  ;;  %v432_v58 = vsel %vm422_vm2, nan, %v431_v42 }
  0xc4   : > { %v633_v53 = vsel %vm631_vm5, %v2812_v43, %v632_v48  ;;  %v493_v54 = vadd.s32 %v492_v50, %v488_v16  ;;  %v1672_v56 = vsel %vm1665_vm14, %v1668_v23, %v1671_v21  ;;  %v742_v40 = vand.u32 2147483647, %v3528_v26 }
  0xc5   : > { %v637_v45 = vsel %vm630_vm6, %v633_v53, %v636_v35  ;;  %v306_v60 = vor.u32 4788187, %v305_v49  ;;  %v309_v20 = vcvt.s32.f32 %v302_v52  ;;  %v1673_v62 = vsel %vm628_vm7, nan, %v1672_v56 }
  0xc6   : > { %v638_v31 = vsel %vm628_vm7, nan, %v637_v45  ;;  %v494_v0 = vadd.s32 536870912, %v493_v54  ;;  %v2670_v63 = vpack.c.bf16 %v1673_v62, %v1465_v19  ;;  %v746_v15 = vshrl.u32 %v745_v51, 23 }
  0xc7   : > { %v2678_v61 = vpack.c.bf16 %v638_v31, %v432_v58  ;;  %v307_v3 = vand.u32 2147483647, %v306_v60  ;;  %vm3558_vm10 = vcmp.le.f32.partialorder %v227_v24, 0.7853982  ;;  %v749_v27 = vand.u32 8388607, %v742_v40 }
  0xc8   : > { %v495_v7 = vshrl.u32 %v494_v0, 30  ;;  %2671 = vmatprep.subr.bf16.mxu1 %v2670_v63  ;;  %v316_v1 = vsel %vm3558_vm10, 0, %v314_v28  ;;  %v2597_v11 = vadd.s32 4294967169, %v746_v15  ;;  %v951_v59 = vand.u32 2139095040, %v3565_v10 }
  0xc9   : > { %2679 = vmatprep.subr.bf16.mxu0 %v2678_v61  ;;  %v310_v8 = vmul.f32 %v309_v20, %v307_v3  ;;  %v1351_v55 = vadd.s32 3, %v316_v1  ;;  %v750_v37 = vor.u32 8388608, %v749_v27  ;;  %v948_v5 = vand.u32 2147483647, %v3565_v10 }
  0xca   : > { %v496_v12 = vshll.u32 %v495_v7, 30  ;;  %v752_v22 = vadd.s32 1, %v2597_v11  ;;  %v519_v29 = vsub.s32 4, %v495_v7  ;;  %vm435_vm12 = vcmp.lt.s32.totalorder %v3309_v57, 0 }
  0xcb   : > { %v311_v17 = vxor.u32 2147483648, %v310_v8  ;;  %v3583_v39 = vand.u32 3, %v1351_v55  ;;  %v952_v25 = vshrl.u32 %v951_v59, 23  ;;  %vm3587_vm1 = vcmp.le.f32.partialorder %v433_v6, 0.7853982 }
  0xcc   : > { %v3569_v24 = vsub.s32 %v493_v54, %v496_v12  ;;  %vm753_vm11 = vcmp.gt.s32.totalorder %v752_v22, 0  ;;  %v520_v16 = vsel %vm435_vm12, %v519_v29, %v495_v7  ;;  %v489_v42 = vadd.s32 %v3510_v18, %v3502_v9 }
  0xcd   : > { %v312_v2 = vsel %vm229_vm3, %v311_v17, %v310_v8  ;;  %v754_v43 = vsel %vm753_vm11, %v752_v22, 0  ;;  %v3593_v48 = vand.u32 3, %v316_v1  ;;  %v3595_v19 = vshll.u32 %v750_v37, 8 }
  0xce   : > { %v315_v13 = vsel %vm3558_vm10, %v3231_v4, %v312_v2  ;;  %v499_v14 = vsub.s32 0, %v3569_v24  ;;  %v756_v44 = vand.u32 31, %v754_v43  ;;  %v3599_v50 = vand.u32 8388607, %v948_v5 }
  0xcf   : > { %2815 = vcosq.f32 %v315_v13  ;;  %v522_v51 = vsel %vm3587_vm1, 0, %v520_v16  ;;  %vm1357_vm2 = vcmp.eq.s32.totalorder %v3583_v39, 2  ;;  %v3606_v9 = vshrl.u32 %v754_v43, 5 }
  0xd0   : > { %v2586_v28 = vmin.u32 %v499_v14, %v3569_v24  ;;  %2817 = vsinq.f32 %v315_v13  ;;  %v757_v6 = vsub.s32 32, %v756_v44  ;;  %v759_v21 = vshll.u32 %v3011_v30, %v756_v44 }
  0xd1   : > { %v762_v35 = vshll.u32 %v3012_v32, %v756_v44  ;;  %v768_v18 = vshll.u32 %v3014_v36, %v756_v44  ;;  %v2605_v49 = vadd.s32 4294967169, %v952_v25  ;;  %v765_v53 = vshll.u32 %v3013_v34, %v756_v44 }
  0xd2   : > { %v501_v47 = vclz %v2586_v28  ;;  %v760_v23 = vshrl.u32 %v3012_v32, %v757_v6  ;;  %v763_v58 = vshrl.u32 %v3013_v34, %v757_v6  ;;  %v766_v54 = vshrl.u32 %v3014_v36, %v757_v6 }
  0xd3   : > { %v1559_v56 = vadd.s32 3, %v522_v51  ;;  %vm325_vm4 = vcmp.eq.s32.totalorder %v3593_v48, 2  ;;  %v769_v45 = vshrl.u32 %v3015_v38, %v757_v6  ;;  %v771_v60 = vshll.u32 %v3015_v38, %v756_v44 }
  0xd4   : > { %v2587_v52 = vadd.s32 4294967294, %v501_v47  ;;  %vm1354_vm5 = vcmp.eq.s32.totalorder %v3583_v39, 0  ;;  %v761_v62 = vor.u32 %v760_v23, %v759_v21  ;;  %v764_v31 = vor.u32 %v763_v58, %v762_v35 }
  0xd5   : > { %v772_v0 = vshrl.u32 %v3016_v46, %v757_v6  ;;  %v770_v15 = vor.u32 %v769_v45, %v768_v18  ;;  %vm322_vm6 = vcmp.eq.s32.totalorder %v3593_v48, 0  ;;  %v758_v7 = vshrl.u32 %v3011_v30, %v757_v6 }
  0xd6   : > { %vm2588_vm3 = vcmp.lt.s32.totalorder %v2587_v52, 0  ;;  %v767_v8 = vor.u32 %v766_v54, %v765_v53  ;;  %vm774_vm7 = vcmp.lt.s32.totalorder %v3606_v9, 1  ;;  %vm777_vm8 = vcmp.lt.s32.totalorder %v3606_v9, 4 }
  0xd7   : > { %v504_v20 = vsel %vm2588_vm3, 0, %v2587_v52  ;;  %v3623_v12 = vand.u32 3, %v522_v51  ;;  %vm776_vm14 = vcmp.lt.s32.totalorder %v3606_v9, 3  ;;  %vm775_vm13 = vcmp.lt.s32.totalorder %v3606_v9, 2 }
  0xd8   : > { %v505_v63 = vsub.s32 32, %v504_v20  ;;  %v506_v61 = vshll.u32 %v3569_v24, %v504_v20  ;;  %v509_v3 = vsub.s32 4294967266, %v504_v20  ;;  %v779_v22 = vsel %vm777_vm8, %v767_v8, 2102212464 }
  0xd9   : > { %v2816_v33 = vpop.eup %2815  ;;  %v783_v24 = vsel %vm777_vm8, %v770_v15, 920167782  ;;  %v773_v59 = vor.u32 %v772_v0, %v771_v60  ;;  %v782_v2 = vsel %vm774_vm7, %v761_v62, %v764_v31  ;;  %v778_v13 = vsel %vm774_vm7, %v758_v7, %v761_v62 }
  0xda   : > { %v507_v1 = vshrl.u32 %v489_v42, %v505_v63  ;;  %v510_v11 = vadd.s32 127, %v509_v3  ;;  %v2818_v27 = vpop.eup %2817  ;;  %v326_v17 = vxor.u32 2147483648, %v2816_v33  ;;  %v784_v14 = vsel %vm776_vm14, %v767_v8, %v783_v24 }
  0xdb   : > { %v956_v37 = vor.u32 8388608, %v3599_v50  ;;  %v958_v43 = vadd.s32 1, %v2605_v49  ;;  %v323_v28 = vxor.u32 2147483648, %v2818_v27  ;;  %v780_v42 = vsel %vm776_vm14, %v764_v31, %v779_v22 }
  0xdc   : > { %v508_v29 = vor.u32 %v507_v1, %v506_v61  ;;  %v511_v55 = vshll.u32 %v510_v11, 23  ;;  %v3642_v44 = vsel %vm1357_vm2, %v326_v17, %v2818_v27  ;;  %v3644_v47 = vand.u32 3, %v1559_v56 }
  0xdd   : > { %v785_v51 = vsel %vm775_vm13, %v782_v2, %v784_v14  ;;  %v786_v6 = vsel %vm774_vm7, %v764_v31, %v767_v8  ;;  %v787_v21 = vsel %vm777_vm8, %v773_v59, 1326507024  ;;  %v3659_v18 = vsel %vm325_vm4, %v326_v17, %v2818_v27 }
  0xde   : > { %v512_v16 = vor.u32 4788187, %v511_v55  ;;  %v515_v25 = vcvt.s32.f32 %v508_v29  ;;  %v3653_v35 = vmul.u32.u64.low %v3595_v19, %v785_v51  ;;  %v3654_v52 = vmul.u32.u64.high %v3595_v19, %v785_v51, %v3653_v35 }
  0xdf   : > { %v781_v49 = vsel %vm775_vm13, %v778_v13, %v780_v42  ;;  %v788_v23 = vsel %vm776_vm14, %v770_v15, %v787_v21  ;;  %vm959_vm15 = vcmp.gt.s32.totalorder %v958_v43, 0  ;;  %v3667_v53 = vsel %vm1354_vm5, %v2816_v33, %v323_v28 }
  0xe0   : > { %v513_v50 = vand.u32 2147483647, %v512_v16  ;;  %v789_v54 = vsel %vm775_vm13, %v786_v6, %v788_v23  ;;  %v960_v56 = vsel %vm959_vm15, %v958_v43, 0  ;;  %v324_v0 = vsel %vm322_vm6, %v2816_v33, %v323_v28  ;;  %v3710_v28 = vld [vmem:[%s3212_s17 + $0x20] sm:$0xff] }
  0xe1   : > { %v3672_v45 = vmul.u32.u64.low %v3595_v19, %v789_v54  ;;  %v3673_v60 = vmul.u32.u64.high %v3595_v19, %v789_v54, %v3672_v45  ;;  %v3675_v20 = vshrl.u32 %v960_v56, 5  ;;  %v962_v62 = vand.u32 31, %v960_v56 }
  0xe2   : > { %v516_v58 = vmul.f32 %v515_v25, %v513_v50  ;;  %v797_v63 = vmul.u32 %v3595_v19, %v781_v49  ;;  %v800_v61 = vadd.s32 1, %v3654_v52  ;;  %vm1353_vm9 = vcmp.lt.s32.totalorder %v3583_v39, 2 }
  0xe3   : > { %v963_v9 = vsub.s32 32, %v962_v62  ;;  %v965_v3 = vshll.u32 %v3011_v30, %v962_v62  ;;  %v968_v15 = vshll.u32 %v3012_v32, %v962_v62  ;;  %v3684_v7 = vshll.u32 %v956_v37, 8 }
  0xe4   : > { %v517_v31 = vxor.u32 2147483648, %v516_v58  ;;  %vm321_vm0 = vcmp.lt.s32.totalorder %v3593_v48, 2  ;;  %v971_v33 = vshll.u32 %v3013_v34, %v962_v62  ;;  %v974_v19 = vshll.u32 %v3014_v36, %v962_v62 }
  0xe5   : > { %v977_v1 = vshll.u32 %v3015_v38, %v962_v62  ;;  %vm799_vm10 = vc.u32 %v3673_v60, %v3653_v35  ;;  %v964_v27 = vshrl.u32 %v3011_v30, %v963_v9  ;;  %vm980_vm11 = vcmp.lt.s32.totalorder %v3675_v20, 1 }
  0xe6   : > { %v518_v8 = vsel %vm435_vm12, %v517_v31, %v516_v58  ;;  %vm319_vm12 = vweird.f32 %v3231_v4  ;;  %v801_v17 = vsel %vm799_vm10, %v800_v61, %v3654_v52  ;;  %v966_v22 = vshrl.u32 %v3012_v32, %v963_v9 }
  0xe7   : > { %v521_v11 = vsel %vm3587_vm1, %v3309_v57, %v518_v8  ;;  %v969_v24 = vshrl.u32 %v3013_v34, %v963_v9  ;;  %v802_v41 = vadd.s32 %v801_v17, %v797_v63  ;;  %v972_v29 = vshrl.u32 %v3014_v36, %v963_v9 }
  0xe8   : > { %2819 = vcosq.f32 %v521_v11  ;;  %v975_v55 = vshrl.u32 %v3015_v38, %v963_v9  ;;  %v967_v59 = vor.u32 %v966_v22, %v965_v3  ;;  %v978_v13 = vshrl.u32 %v3016_v46, %v963_v9 }
  0xe9   : > { %2821 = vsinq.f32 %v521_v11  ;;  %v970_v2 = vor.u32 %v969_v24, %v968_v15  ;;  %vm981_vm1 = vcmp.lt.s32.totalorder %v3675_v20, 2  ;;  %vm528_vm2 = vcmp.eq.s32.totalorder %v3623_v12, 0 }
  0xea   : > { %v803_v14 = vadd.s32 536870912, %v802_v41  ;;  %v973_v37 = vor.u32 %v972_v29, %v971_v33  ;;  %v976_v43 = vor.u32 %v975_v55, %v974_v19  ;;  %vm982_vm3 = vcmp.lt.s32.totalorder %v3675_v20, 3 }
  0xeb   : > { %vm527_vm4 = vcmp.lt.s32.totalorder %v3623_v12, 2  ;;  %v979_v16 = vor.u32 %v978_v13, %v977_v1  ;;  %vm983_vm5 = vcmp.lt.s32.totalorder %v3675_v20, 4  ;;  %v984_v25 = vsel %vm980_vm11, %v964_v27, %v967_v59 }
  0xec   : > { %v988_v42 = vsel %vm980_vm11, %v967_v59, %v970_v2  ;;  %vm525_vm6 = vweird.f32 %v3309_v57  ;;  %v804_v51 = vshrl.u32 %v803_v14, 30  ;;  %v985_v6 = vsel %vm983_vm5, %v973_v37, 2102212464 }
  0xed   : > { %v989_v50 = vsel %vm983_vm5, %v976_v43, 920167782  ;;  %v992_v21 = vsel %vm980_vm11, %v970_v2, %v973_v37  ;;  %v986_v52 = vsel %vm982_vm3, %v970_v2, %v985_v6  ;;  %v993_v23 = vsel %vm983_vm5, %v979_v16, 1326507024 }
  0xee   : > { %v990_v49 = vsel %vm982_vm3, %v973_v37, %v989_v50  ;;  %v642_v58 = vand.u32 2139095040, %v3710_v28  ;;  %vm1561_vm7 = vcmp.lt.s32.totalorder %v3644_v47, 2  ;;  %vm531_vm8 = vcmp.eq.s32.totalorder %v3623_v12, 2 }
  0xef   : > { %v805_v54 = vshll.u32 %v804_v51, 30  ;;  %v991_v56 = vsel %vm981_vm1, %v988_v42, %v990_v49  ;;  %v1360_v45 = vsel %vm1353_vm9, %v3667_v53, %v3642_v44  ;;  %vm744_vm14 = vcmp.lt.s32.totalorder %v3528_v26, 0 }
  0xf0   : > { %v994_v62 = vsel %vm982_vm3, %v976_v43, %v993_v23  ;;  %v3738_v31 = vmul.u32.u64.low %v3684_v7, %v991_v56  ;;  %v3739_v63 = vmul.u32.u64.high %v3684_v7, %v991_v56, %v3738_v31  ;;  %v328_v61 = vsel %vm321_vm0, %v324_v0, %v3659_v18 }
  0xf1   : > { %v3745_v9 = vsub.s32 %v802_v41, %v805_v54  ;;  %v987_v39 = vsel %vm981_vm1, %v984_v25, %v986_v52  ;;  %v995_v44 = vsel %vm981_vm1, %v992_v21, %v994_v62  ;;  %vm1565_vm13 = vcmp.eq.s32.totalorder %v3644_v47, 2 }
  0xf2   : > { %v2820_v53 = vpop.eup %2819  ;;  %v3753_v3 = vmul.u32.u64.low %v3684_v7, %v995_v44  ;;  %v3754_v15 = vmul.u32.u64.high %v3684_v7, %v995_v44, %v3753_v3  ;;  %v643_v8 = vshrl.u32 %v642_v58, 23  ;;  %v1361_v48 = vsel %vm319_vm12, nan, %v1360_v45 }
  0xf3   : > { %v2822_v33 = vpop.eup %2821  ;;  %v532_v19 = vxor.u32 2147483648, %v2820_v53  ;;  %vm1562_vm15 = vcmp.eq.s32.totalorder %v3644_v47, 0  ;;  %v808_v18 = vsub.s32 0, %v3745_v9  ;;  %v329_v20 = vsel %vm319_vm12, nan, %v328_v61 }
  0xf4   : > { %v529_v0 = vxor.u32 2147483648, %v2822_v33  ;;  %v1003_v1 = vmul.u32 %v3684_v7, %v987_v39  ;;  %v1006_v11 = vadd.s32 1, %v3739_v63  ;;  %v828_v24 = vsub.s32 4, %v804_v51 }
  0xf5   : > { %v1567_v27 = vsel %vm1565_vm13, %v532_v19, %v2822_v33  ;;  %v533_v17 = vsel %vm531_vm8, %v532_v19, %v2822_v33  ;;  %v2598_v22 = vmin.u32 %v808_v18, %v3745_v9  ;;  %vm1005_vm9 = vc.u32 %v3754_v15, %v3738_v31  ;;  %v3809_v19 = vld [vmem:[%s3212_s17 + $0x30] sm:$0xff] }
  0xf6   : > { %v1564_v41 = vsel %vm1562_vm15, %v2820_v53, %v529_v0  ;;  %v530_v29 = vsel %vm528_vm2, %v2820_v53, %v529_v0  ;;  %v2593_v4 = vadd.s32 4294967169, %v643_v8  ;;  %v1007_v2 = vsel %vm1005_vm9, %v1006_v11, %v3739_v63 }
  0xf7   : > { %v1568_v7 = vsel %vm1561_vm7, %v1564_v41, %v1567_v27  ;;  %v534_v55 = vsel %vm527_vm4, %v530_v29, %v533_v17  ;;  %v810_v59 = vclz %v2598_v22  ;;  %v1008_v37 = vadd.s32 %v1007_v2, %v1003_v1 }
  0xf8   : > { %v1569_v13 = vsel %vm525_vm6, nan, %v1568_v7  ;;  %v535_v14 = vsel %vm525_vm6, nan, %v534_v55  ;;  %v639_v43 = vand.u32 2147483647, %v3710_v28  ;;  %v829_v47 = vsel %vm744_vm14, %v828_v24, %v804_v51 }
  0xf9   : > { %v2672_v16 = vpack.c.bf16 %v1569_v13, %v1361_v48  ;;  %v2680_v25 = vpack.c.bf16 %v535_v14, %v329_v20  ;;  %v2599_v42 = vadd.s32 4294967294, %v810_v59  ;;  %v1009_v12 = vadd.s32 536870912, %v1008_v37 }
  0xfa   : > { %vm3785_vm0 = vcmp.le.f32.partialorder %v742_v40, 0.7853982  ;;  %v798_v57 = vadd.s32 %v3653_v35, %v3673_v60  ;;  %v649_v50 = vadd.s32 1, %v2593_v4  ;;  %v646_v51 = vand.u32 8388607, %v639_v43 }
  0xfb   : > { %2673 = vmatpush1.bf16.msra.mxu1 %v2672_v16  ;;  %2681 = vmatpush1.bf16.msra.mxu0 %v2680_v25  ;;  %vm2600_vm10 = vcmp.lt.s32.totalorder %v2599_v42, 0  ;;  %v831_v52 = vsel %vm3785_vm0, 0, %v829_v47  ;;  %v1010_v49 = vshrl.u32 %v1009_v12, 30  ;;  %vm950_vm12 = vcmp.lt.s32.totalorder %v3565_v10, 0 }
  0xfc   : > { %v813_v21 = vsel %vm2600_vm10, 0, %v2599_v42  ;;  %vm650_vm11 = vcmp.gt.s32.totalorder %v649_v50, 0  ;;  %v1871_v61 = vadd.s32 3, %v831_v52  ;;  %v647_v39 = vor.u32 8388608, %v646_v51 }
  0xfd   : > { %v814_v23 = vsub.s32 32, %v813_v21  ;;  %v815_v58 = vshll.u32 %v3745_v9, %v813_v21  ;;  %v818_v40 = vsub.s32 4294967266, %v813_v21  ;;  %v1011_v54 = vshll.u32 %v1010_v49, 30 }
  0xfe   : > { %v651_v56 = vsel %vm650_vm11, %v649_v50, 0  ;;  %v1034_v60 = vsub.s32 4, %v1010_v49  ;;  %vm3801_vm1 = vcmp.le.f32.partialorder %v948_v5, 0.7853982  ;;  %v3806_v33 = vand.u32 3, %v831_v52 }
  0xff   : > { %v816_v45 = vshrl.u32 %v798_v57, %v814_v23  ;;  %v819_v35 = vadd.s32 127, %v818_v40  ;;  %v653_v62 = vand.u32 31, %v651_v56  ;;  %v3796_v63 = vsub.s32 %v1008_v37, %v1011_v54 }
 0x100   : > { %v1035_v20 = vsel %vm950_vm12, %v1034_v60, %v1010_v49  ;;  %v1004_v5 = vadd.s32 %v3738_v31, %v3754_v15  ;;  %v3818_v27 = vand.u32 3, %v1871_v61  ;;  %v3820_v17 = vshll.u32 %v647_v39, 8 }
 0x101   : > { %v817_v44 = vor.u32 %v816_v45, %v815_v58  ;;  %v820_v53 = vshll.u32 %v819_v35, 23  ;;  %v654_v3 = vsub.s32 32, %v653_v62  ;;  %v1014_v8 = vsub.s32 0, %v3796_v63 }
 0x102   : > { %v656_v48 = vshll.u32 %v3011_v30, %v653_v62  ;;  %v652_v24 = vshrl.u32 %v651_v56, 5  ;;  %v659_v41 = vshll.u32 %v3012_v32, %v653_v62  ;;  %v848_v29 = vand.u32 2139095040, %v3809_v19 }
 0x103   : > { %v821_v18 = vor.u32 4788187, %v820_v53  ;;  %v824_v0 = vcvt.s32.f32 %v817_v44  ;;  %v657_v1 = vshrl.u32 %v3012_v32, %v654_v3  ;;  %v2606_v11 = vmin.u32 %v1014_v8, %v3796_v63 }
 0x104   : > { %v3826_v7 = vsel %vm3801_vm1, 0, %v1035_v20  ;;  %v655_v55 = vshrl.u32 %v3011_v30, %v654_v3  ;;  %v660_v59 = vshrl.u32 %v3013_v34, %v654_v3  ;;  %v662_v2 = vshll.u32 %v3013_v34, %v653_v62 }
 0x105   : > { %v822_v22 = vand.u32 2147483647, %v821_v18  ;;  %v1016_v4 = vclz %v2606_v11  ;;  %v658_v31 = vor.u32 %v657_v1, %v656_v48  ;;  %v663_v13 = vshrl.u32 %v3014_v36, %v654_v3 }
 0x106   : > { %v665_v37 = vshll.u32 %v3014_v36, %v653_v62  ;;  %v666_v16 = vshrl.u32 %v3015_v38, %v654_v3  ;;  %v668_v25 = vshll.u32 %v3015_v38, %v653_v62  ;;  %v661_v47 = vor.u32 %v660_v59, %v659_v41 }
 0x107   : > { %v825_v15 = vmul.f32 %v824_v0, %v822_v22  ;;  %v2607_v14 = vadd.s32 4294967294, %v1016_v4  ;;  %v664_v12 = vor.u32 %v663_v13, %v662_v2  ;;  %v669_v57 = vshrl.u32 %v3016_v46, %v654_v3  ;;  %v3872_v13 = vld [vmem:[%s3212_s17 + $0x48] sm:$0xf] }
 0x108   : > { %v667_v50 = vor.u32 %v666_v16, %v665_v37  ;;  %vm671_vm3 = vcmp.lt.s32.totalorder %v652_v24, 1  ;;  %vm672_vm4 = vcmp.lt.s32.totalorder %v652_v24, 2  ;;  %vm673_vm5 = vcmp.lt.s32.totalorder %v652_v24, 3 }
 0x109   : > { %v826_v42 = vxor.u32 2147483648, %v825_v15  ;;  %vm2608_vm2 = vcmp.lt.s32.totalorder %v2607_v14, 0  ;;  %v670_v49 = vor.u32 %v669_v57, %v668_v25  ;;  %vm674_vm6 = vcmp.lt.s32.totalorder %v652_v24, 4 }
 0x10a   : > { %v1019_v52 = vsel %vm2608_vm2, 0, %v2607_v14  ;;  %v675_v54 = vsel %vm671_vm3, %v655_v55, %v658_v31  ;;  %v679_v56 = vsel %vm671_vm3, %v658_v31, %v661_v47  ;;  %v676_v60 = vsel %vm674_vm6, %v664_v12, 2102212464 }
 0x10b   : > { %v827_v21 = vsel %vm744_vm14, %v826_v42, %v825_v15  ;;  %v1020_v23 = vsub.s32 32, %v1019_v52  ;;  %v1021_v58 = vshll.u32 %v3796_v63, %v1019_v52  ;;  %v1024_v40 = vsub.s32 4294967266, %v1019_v52 }
 0x10c   : > { %v830_v51 = vsel %vm3785_vm0, %v3528_v26, %v827_v21  ;;  %v677_v62 = vsel %vm673_vm5, %v661_v47, %v676_v60  ;;  %v680_v61 = vsel %vm674_vm6, %v667_v50, 920167782  ;;  %v683_v6 = vsel %vm671_vm3, %v661_v47, %v664_v12 }
 0x10d   : > { %2823 = vcosq.f32 %v830_v51  ;;  %v1022_v45 = vshrl.u32 %v1004_v5, %v1020_v23  ;;  %v1025_v35 = vadd.s32 127, %v1024_v40  ;;  %v684_v39 = vsel %vm674_vm6, %v670_v49, 1326507024 }
 0x10e   : > { %2825 = vsinq.f32 %v830_v51  ;;  %v681_v63 = vsel %vm673_vm5, %v664_v12, %v680_v61  ;;  %v845_v3 = vand.u32 2147483647, %v3809_v19  ;;  %v2079_v8 = vadd.s32 3, %v3826_v7 }
 0x10f   : > { %v1023_v44 = vor.u32 %v1022_v45, %v1021_v58  ;;  %v1026_v53 = vshll.u32 %v1025_v35, 23  ;;  %v682_v48 = vsel %vm672_vm4, %v679_v56, %v681_v63  ;;  %v685_v18 = vsel %vm673_vm5, %v667_v50, %v684_v39 }
 0x110   : > { %v849_v0 = vshrl.u32 %v848_v29, 23  ;;  %v678_v5 = vsel %vm672_vm4, %v675_v54, %v677_v62  ;;  %v686_v11 = vsel %vm672_vm4, %v683_v6, %v685_v18  ;;  %vm1873_vm7 = vcmp.lt.s32.totalorder %v3818_v27, 2 }
 0x111   : > { %v1027_v20 = vor.u32 4788187, %v1026_v53  ;;  %v1030_v1 = vcvt.s32.f32 %v1023_v44  ;;  %v3854_v22 = vmul.u32.u64.low %v3820_v17, %v686_v11  ;;  %v3855_v41 = vmul.u32.u64.high %v3820_v17, %v686_v11, %v3854_v22 }
 0x112   : > { %v3858_v4 = vmul.u32.u64.low %v3820_v17, %v682_v48  ;;  %v3859_v55 = vmul.u32.u64.high %v3820_v17, %v682_v48, %v3858_v4  ;;  %v2601_v29 = vadd.s32 4294967169, %v849_v0  ;;  %v852_v15 = vand.u32 8388607, %v845_v3 }
 0x113   : > { %v1028_v31 = vand.u32 2147483647, %v1027_v20  ;;  %vm1874_vm8 = vcmp.eq.s32.totalorder %v3818_v27, 0  ;;  %vm1877_vm14 = vcmp.eq.s32.totalorder %v3818_v27, 2  ;;  %vm836_vm13 = vcmp.lt.s32.totalorder %v3806_v33, 2 }
 0x114   : > { %vm837_vm15 = vcmp.eq.s32.totalorder %v3806_v33, 0  ;;  %vm840_vm9 = vcmp.eq.s32.totalorder %v3806_v33, 2  ;;  %v694_v59 = vmul.u32 %v3820_v17, %v678_v5  ;;  %v855_v2 = vadd.s32 1, %v2601_v29 }
 0x115   : > { %v1031_v24 = vmul.f32 %v1030_v1, %v1028_v31  ;;  %v3874_v37 = vand.u32 3, %v2079_v8  ;;  %v3877_v16 = vand.u32 3, %v3826_v7  ;;  %vm696_vm0 = vc.u32 %v3855_v41, %v3858_v4 }
 0x116   : > { %v697_v25 = vadd.s32 1, %v3859_v55  ;;  %v853_v57 = vor.u32 8388608, %v852_v15  ;;  %vm856_vm10 = vcmp.gt.s32.totalorder %v855_v2, 0  ;;  %v1157_v52 = vand.u32 2139095040, %v3872_v13 }
 0x117   : > { %v2824_v14 = vpop.eup %2823  ;;  %v1032_v12 = vxor.u32 2147483648, %v1031_v24  ;;  %v857_v21 = vsel %vm856_vm10, %v855_v2, 0  ;;  %vm834_vm11 = vweird.f32 %v3528_v26  ;;  %vm2082_vm2 = vcmp.eq.s32.totalorder %v3874_v37, 0 }
 0x118   : > { %v2826_v42 = vpop.eup %2825  ;;  %v841_v47 = vxor.u32 2147483648, %v2824_v14  ;;  %v698_v50 = vsel %vm696_vm0, %v697_v25, %v3859_v55  ;;  %v3902_v60 = vshrl.u32 %v857_v21, 5  ;;  %v859_v62 = vand.u32 31, %v857_v21 }
 0x119   : > { %v838_v17 = vxor.u32 2147483648, %v2826_v42  ;;  %v1033_v7 = vsel %vm950_vm12, %v1032_v12, %v1031_v24  ;;  %v699_v23 = vadd.s32 %v698_v50, %v694_v59  ;;  %vm2085_vm12 = vcmp.eq.s32.totalorder %v3874_v37, 2 }
 0x11a   : > { %v1879_v49 = vsel %vm1877_vm14, %v841_v47, %v2826_v42  ;;  %v842_v51 = vsel %vm840_vm9, %v841_v47, %v2826_v42  ;;  %v1036_v58 = vsel %vm3801_vm1, %v3565_v10, %v1033_v7  ;;  %vm1046_vm1 = vcmp.eq.s32.totalorder %v3877_v16, 2 }
 0x11b   : > { %v1876_v40 = vsel %vm1874_vm8, %v2824_v14, %v838_v17  ;;  %v839_v54 = vsel %vm837_vm15, %v2824_v14, %v838_v17  ;;  %2827 = vcosq.f32 %v1036_v58  ;;  %v700_v45 = vadd.s32 536870912, %v699_v23 }
 0x11c   : > { %v1880_v56 = vsel %vm1873_vm7, %v1876_v40, %v1879_v49  ;;  %2829 = vsinq.f32 %v1036_v58  ;;  %v843_v35 = vsel %vm836_vm13, %v839_v54, %v842_v51  ;;  %v3912_v27 = vshll.u32 %v853_v57, 8 }
 0x11d   : > { %v3906_v9 = vsel %vm834_vm11, nan, %v1880_v56  ;;  %v3910_v61 = vshrl.u32 %v700_v45, 30  ;;  %v3914_v6 = vshrl.u32 %v1157_v52, 23  ;;  %vm1043_vm3 = vcmp.eq.s32.totalorder %v3877_v16, 0 }
 0x11e   : > { %v860_v33 = vsub.s32 32, %v859_v62  ;;  %v862_v39 = vshll.u32 %v3011_v30, %v859_v62  ;;  %v865_v44 = vshll.u32 %v3012_v32, %v859_v62  ;;  %v868_v53 = vshll.u32 %v3013_v34, %v859_v62 }
 0x11f   : > { %vm2081_vm4 = vcmp.lt.s32.totalorder %v3874_v37, 2  ;;  %v3924_v63 = vsel %vm834_vm11, nan, %v843_v35  ;;  %vm1042_vm5 = vcmp.lt.s32.totalorder %v3877_v16, 2  ;;  %v702_v8 = vshll.u32 %v3910_v61, 30 }
 0x120   : > { %v871_v48 = vshll.u32 %v3014_v36, %v859_v62  ;;  %v874_v18 = vshll.u32 %v3015_v38, %v859_v62  ;;  %vm1040_vm6 = vweird.f32 %v3565_v10  ;;  %v863_v0 = vshrl.u32 %v3012_v32, %v860_v33 }
 0x121   : > { %v866_v20 = vshrl.u32 %v3013_v34, %v860_v33  ;;  %v869_v1 = vshrl.u32 %v3014_v36, %v860_v33  ;;  %vm877_vm7 = vcmp.lt.s32.totalorder %v3902_v60, 1  ;;  %v703_v26 = vsub.s32 %v699_v23, %v702_v8 }
 0x122   : > { %v861_v5 = vshrl.u32 %v3011_v30, %v860_v33  ;;  %v872_v11 = vshrl.u32 %v3015_v38, %v860_v33  ;;  %v875_v22 = vshrl.u32 %v3016_v46, %v860_v33  ;;  %v864_v55 = vor.u32 %v863_v0, %v862_v39 }
 0x123   : > { %v867_v31 = vor.u32 %v866_v20, %v865_v44  ;;  %v870_v29 = vor.u32 %v869_v1, %v868_v53  ;;  %vm879_vm8 = vcmp.lt.s32.totalorder %v3902_v60, 3  ;;  %v705_v15 = vsub.s32 0, %v703_v26 }
 0x124   : > { %v873_v24 = vor.u32 %v872_v11, %v871_v48  ;;  %v876_v59 = vor.u32 %v875_v22, %v874_v18  ;;  %vm880_vm14 = vcmp.lt.s32.totalorder %v3902_v60, 4  ;;  %vm878_vm13 = vcmp.lt.s32.totalorder %v3902_v60, 2 }
 0x125   : > { %v882_v2 = vsel %vm880_vm14, %v870_v29, 2102212464  ;;  %v885_v14 = vsel %vm877_vm7, %v864_v55, %v867_v31  ;;  %v889_v25 = vsel %vm877_vm7, %v867_v31, %v870_v29  ;;  %v2828_v42 = vpop.eup %2827  ;;  %v2594_v47 = vmin.u32 %v705_v15, %v703_v26 }
 0x126   : > { %v881_v12 = vsel %vm877_vm7, %v861_v5, %v864_v55  ;;  %v886_v57 = vsel %vm880_vm14, %v873_v24, 920167782  ;;  %v890_v17 = vsel %vm880_vm14, %v876_v59, 1326507024  ;;  %v2830_v50 = vpop.eup %2829  ;;  %v1047_v21 = vxor.u32 2147483648, %v2828_v42 }
 0x127   : > { %v883_v52 = vsel %vm879_vm8, %v867_v31, %v882_v2  ;;  %v887_v7 = vsel %vm879_vm8, %v870_v29, %v886_v57  ;;  %v891_v49 = vsel %vm879_vm8, %v873_v24, %v890_v17  ;;  %v1044_v51 = vxor.u32 2147483648, %v2830_v50 }
 0x128   : > { %v707_v23 = vclz %v2594_v47  ;;  %v888_v58 = vsel %vm878_vm13, %v885_v14, %v887_v7  ;;  %v892_v40 = vsel %vm878_vm13, %v889_v25, %v891_v49  ;;  %v2087_v54 = vsel %vm2085_vm12, %v1047_v21, %v2830_v50 }
 0x129   : > { %v1048_v56 = vsel %vm1046_vm1, %v1047_v21, %v2830_v50  ;;  %v3962_v45 = vmul.u32.u64.low %v3912_v27, %v892_v40  ;;  %v3963_v35 = vmul.u32.u64.high %v3912_v27, %v892_v40, %v3962_v45  ;;  %v2084_v62 = vsel %vm2082_vm2, %v2828_v42, %v1044_v51  ;;  %v4004_v21 = vld [vmem:[%s3212_s17 + $0x40] sm:$0xf] }
 0x12a   : > { %v1045_v33 = vsel %vm1043_vm3, %v2828_v42, %v1044_v51  ;;  %v2595_v39 = vadd.s32 4294967294, %v707_v23  ;;  %v884_v44 = vsel %vm878_vm13, %v881_v12, %v883_v52  ;;  %v2088_v53 = vsel %vm2081_vm4, %v2084_v62, %v2087_v54 }
 0x12b   : > { %v1049_v8 = vsel %vm1042_vm5, %v1045_v33, %v1048_v56  ;;  %v3976_v48 = vmul.u32.u64.low %v3912_v27, %v888_v58  ;;  %v3977_v18 = vmul.u32.u64.high %v3912_v27, %v888_v58, %v3976_v48  ;;  %v2089_v0 = vsel %vm1040_vm6, nan, %v2088_v53 }
 0x12c   : > { %v1050_v20 = vsel %vm1040_vm6, nan, %v1049_v8  ;;  %v695_v60 = vadd.s32 %v3858_v4, %v3855_v41  ;;  %vm2596_vm15 = vcmp.lt.s32.totalorder %v2595_v39, 0  ;;  %v2674_v37 = vpack.c.bf16 %v2089_v0, %v3906_v9 }
 0x12d   : > { %v2682_v1 = vpack.c.bf16 %v1050_v20, %v3924_v63  ;;  %v710_v16 = vsel %vm2596_vm15, 0, %v2595_v39  ;;  %v900_v5 = vmul.u32 %v3912_v27, %v884_v44  ;;  %vm902_vm9 = vc.u32 %v3963_v35, %v3976_v48 }
 0x12e   : > { %v711_v11 = vsub.s32 32, %v710_v16  ;;  %v712_v22 = vshll.u32 %v703_v26, %v710_v16  ;;  %v715_v55 = vsub.s32 4294967266, %v710_v16  ;;  %2675 = vmatprep.subr.bf16.mxu1 %v2674_v37  ;;  %v903_v10 = vadd.s32 1, %v3977_v18 }
 0x12f   : > { %2683 = vmatprep.subr.bf16.mxu0 %v2682_v1  ;;  %v2613_v31 = vadd.s32 4294967169, %v3914_v6  ;;  %v1154_v27 = vand.u32 2147483647, %v3872_v13  ;;  %v725_v26 = vsub.s32 4, %v3910_v61  ;;  %vm641_vm0 = vcmp.lt.s32.totalorder %v3710_v28, 0 }
 0x130   : > { %v713_v41 = vshrl.u32 %v695_v60, %v711_v11  ;;  %v716_v4 = vadd.s32 127, %v715_v55  ;;  %v904_v9 = vsel %vm902_vm9, %v903_v10, %v3977_v18  ;;  %vm4008_vm11 = vcmp.le.f32.partialorder %v639_v43, 0.7853982 }
 0x131   : > { %v905_v15 = vadd.s32 %v904_v9, %v900_v5  ;;  %v1164_v24 = vadd.s32 1, %v2613_v31  ;;  %v1161_v42 = vand.u32 8388607, %v1154_v27  ;;  %v726_v12 = vsel %vm641_vm0, %v725_v26, %v3910_v61 }
 0x132   : > { %v714_v29 = vor.u32 %v713_v41, %v712_v22  ;;  %v717_v63 = vshll.u32 %v716_v4, 23  ;;  %v3017_v49 = vmov 0.0   ;;  %v4014_v51 = vsel %vm4008_vm11, 0, %v726_v12 }
 0x133   : > { %v906_v14 = vadd.s32 536870912, %v905_v15  ;;  %vm1165_vm10 = vcmp.gt.s32.totalorder %v1164_v24, 0  ;;  %2373 = vmatprep.mubr.f32.mxu1 %v3017_v49  ;;  %2453 = vmatprep.mubr.f32.mxu0 %v3017_v49  ;;  %v1162_v23 = vor.u32 8388608, %v1161_v42  ;;  %v1054_v43 = vand.u32 2139095040, %v4004_v21 }
 0x134   : > { %v718_v59 = vor.u32 4788187, %v717_v63  ;;  %v721_v2 = vcvt.s32.f32 %v714_v29  ;;  %v1166_v47 = vsel %vm1165_vm10, %v1164_v24, 0  ;;  %v901_v53 = vadd.s32 %v3976_v48, %v3963_v35 }
 0x135   : > { %v3995_v25 = vshrl.u32 %v906_v14, 30  ;;  %v1168_v57 = vand.u32 31, %v1166_v47  ;;  %v1167_v39 = vshrl.u32 %v1166_v47, 5  ;;  %v1767_v18 = vadd.s32 3, %v4014_v51 }
 0x136   : > { %v719_v6 = vand.u32 2147483647, %v718_v59  ;;  %v1051_v0 = vand.u32 2147483647, %v4004_v21  ;;  %v4029_v37 = vshll.u32 %v1162_v23, 8  ;;  %v1055_v1 = vshrl.u32 %v1054_v43, 23 }
 0x137   : > { %v908_v50 = vshll.u32 %v3995_v25, 30  ;;  %v1169_v7 = vsub.s32 32, %v1168_v57  ;;  %v1171_v40 = vshll.u32 %v3011_v30, %v1168_v57  ;;  %v1174_v54 = vshll.u32 %v3012_v32, %v1168_v57 }
 0x138   : > { %v722_v17 = vmul.f32 %v721_v2, %v719_v6  ;;  %v1177_v33 = vshll.u32 %v3013_v34, %v1168_v57  ;;  %v1180_v60 = vshll.u32 %v3014_v36, %v1168_v57  ;;  %vm847_vm12 = vcmp.lt.s32.totalorder %v3809_v19, 0 }
 0x139   : > { %v909_v61 = vsub.s32 %v905_v15, %v908_v50  ;;  %v1172_v45 = vshrl.u32 %v3012_v32, %v1169_v7  ;;  %v1175_v62 = vshrl.u32 %v3013_v34, %v1169_v7  ;;  %v1178_v44 = vshrl.u32 %v3014_v36, %v1169_v7 }
 0x13a   : > { %v723_v58 = vxor.u32 2147483648, %v722_v17  ;;  %v1181_v35 = vshrl.u32 %v3015_v38, %v1169_v7  ;;  %v1183_v48 = vshll.u32 %v3015_v38, %v1168_v57  ;;  %v1184_v55 = vshrl.u32 %v3016_v46, %v1169_v7 }
 0x13b   : > { %v911_v56 = vsub.s32 0, %v909_v61  ;;  %v1173_v5 = vor.u32 %v1172_v45, %v1171_v40  ;;  %v1176_v11 = vor.u32 %v1175_v62, %v1174_v54  ;;  %v1179_v22 = vor.u32 %v1178_v44, %v1177_v33 }
 0x13c   : > { %v724_v20 = vsel %vm641_vm0, %v723_v58, %v722_v17  ;;  %vm1186_vm1 = vcmp.lt.s32.totalorder %v1167_v39, 1  ;;  %v931_v31 = vsub.s32 4, %v3995_v25  ;;  %v1170_v41 = vshrl.u32 %v3011_v30, %v1169_v7 }
 0x13d   : > { %v2602_v8 = vmin.u32 %v911_v56, %v909_v61  ;;  %vm1189_vm2 = vcmp.lt.s32.totalorder %v1167_v39, 4  ;;  %v727_v4 = vsel %vm4008_vm11, %v3710_v28, %v724_v20  ;;  %v1182_v9 = vor.u32 %v1181_v35, %v1180_v60 }
 0x13e   : > { %v1185_v29 = vor.u32 %v1184_v55, %v1183_v48  ;;  %vm1188_vm3 = vcmp.lt.s32.totalorder %v1167_v39, 3  ;;  %vm1187_vm5 = vcmp.lt.s32.totalorder %v1167_v39, 2  ;;  %v1191_v63 = vsel %vm1189_vm2, %v1179_v22, 2102212464 }
 0x13f   : > { %v913_v16 = vclz %v2602_v8  ;;  %v1194_v15 = vsel %vm1186_vm1, %v1173_v5, %v1176_v11  ;;  %v1195_v24 = vsel %vm1189_vm2, %v1182_v9, 920167782  ;;  %v1198_v59 = vsel %vm1186_vm1, %v1176_v11, %v1179_v22 }
 0x140   : > { %v1199_v2 = vsel %vm1189_vm2, %v1185_v29, 1326507024  ;;  %v1196_v47 = vsel %vm1188_vm3, %v1179_v22, %v1195_v24  ;;  %v1190_v12 = vsel %vm1186_vm1, %v1170_v41, %v1173_v5  ;;  %v1192_v57 = vsel %vm1188_vm3, %v1176_v11, %v1191_v63 }
 0x141   : > { %v2603_v10 = vadd.s32 4294967294, %v913_v16  ;;  %v1200_v17 = vsel %vm1188_vm3, %v1182_v9, %v1199_v2  ;;  %v2609_v50 = vadd.s32 4294967169, %v1055_v1  ;;  %v1197_v49 = vsel %vm1187_vm5, %v1194_v15, %v1196_v47 }
 0x142   : > { %v1201_v23 = vsel %vm1187_vm5, %v1198_v59, %v1200_v17  ;;  %2831 = vcosq.f32 %v727_v4  ;;  %v932_v58 = vsel %vm847_vm12, %v931_v31, %v3995_v25  ;;  %vm4054_vm6 = vcmp.le.f32.partialorder %v845_v3, 0.7853982 }
 0x143   : > { %vm2604_vm4 = vcmp.lt.s32.totalorder %v2603_v10, 0  ;;  %2833 = vsinq.f32 %v727_v4  ;;  %v1061_v56 = vadd.s32 1, %v2609_v50  ;;  %v1193_v62 = vsel %vm1187_vm5, %v1190_v12, %v1192_v57 }
 0x144   : > { %v916_v26 = vsel %vm2604_vm4, 0, %v2603_v10  ;;  %v4060_v33 = vmul.u32.u64.low %v4029_v37, %v1197_v49  ;;  %v4061_v44 = vmul.u32.u64.high %v4029_v37, %v1197_v49, %v4060_v33  ;;  %v4064_v8 = vand.u32 3, %v1767_v18 }
 0x145   : > { %v917_v14 = vsub.s32 32, %v916_v26  ;;  %v918_v6 = vshll.u32 %v909_v61, %v916_v26  ;;  %v921_v42 = vsub.s32 4294967266, %v916_v26  ;;  %v4067_v20 = vand.u32 3, %v4014_v51 }
 0x146   : > { %v4049_v61 = vmul.u32.u64.low %v4029_v37, %v1201_v23  ;;  %v4050_v40 = vmul.u32.u64.high %v4029_v37, %v1201_v23, %v4049_v61  ;;  %v934_v3 = vsel %vm4054_vm6, 0, %v932_v58  ;;  %v1058_v60 = vand.u32 8388607, %v1051_v0 }
 0x147   : > { %v919_v52 = vshrl.u32 %v901_v53, %v917_v14  ;;  %v922_v7 = vadd.s32 127, %v921_v42  ;;  %v1209_v1 = vmul.u32 %v4029_v37, %v1193_v62  ;;  %vm1062_vm8 = vcmp.gt.s32.totalorder %v1061_v56, 0 }
 0x148   : > { %vm1211_vm7 = vc.u32 %v4050_v40, %v4060_v33  ;;  %v1212_v16 = vadd.s32 1, %v4061_v44  ;;  %v1063_v18 = vsel %vm1062_vm8, %v1061_v56, 0  ;;  %vm1770_vm14 = vcmp.eq.s32.totalorder %v4064_v8, 0 }
 0x149   : > { %v920_v54 = vor.u32 %v919_v52, %v918_v6  ;;  %v923_v43 = vshll.u32 %v922_v7, 23  ;;  %vm1773_vm13 = vcmp.eq.s32.totalorder %v4064_v8, 2  ;;  %vm737_vm15 = vcmp.eq.s32.totalorder %v4067_v20, 2 }
 0x14a   : > { %v1065_v51 = vand.u32 31, %v1063_v18  ;;  %v1975_v11 = vadd.s32 3, %v934_v3  ;;  %vm734_vm9 = vcmp.eq.s32.totalorder %v4067_v20, 0  ;;  %v4081_v22 = vand.u32 3, %v934_v3 }
 0x14b   : > { %v924_v25 = vor.u32 4788187, %v923_v43  ;;  %v927_v53 = vcvt.s32.f32 %v920_v54  ;;  %v1213_v37 = vsel %vm1211_vm7, %v1212_v16, %v4061_v44  ;;  %v1059_v35 = vor.u32 8388608, %v1058_v60 }
 0x14c   : > { %v1214_v55 = vadd.s32 %v1213_v37, %v1209_v1  ;;  %v4084_v10 = vshrl.u32 %v1063_v18, 5  ;;  %v1066_v31 = vsub.s32 32, %v1065_v51  ;;  %v2832_v41 = vpop.eup %2831  ;;  %v1068_v4 = vshll.u32 %v3011_v30, %v1065_v51 }
 0x14d   : > { %v925_v39 = vand.u32 2147483647, %v924_v25  ;;  %v1071_v9 = vshll.u32 %v3012_v32, %v1065_v51  ;;  %v1074_v29 = vshll.u32 %v3013_v34, %v1065_v51  ;;  %v1077_v63 = vshll.u32 %v3014_v36, %v1065_v51  ;;  %v2834_v15 = vpop.eup %2833 }
 0x14e   : > { %vm1769_vm0 = vcmp.lt.s32.totalorder %v4064_v8, 2  ;;  %v1215_v24 = vadd.s32 536870912, %v1214_v55  ;;  %v1069_v59 = vshrl.u32 %v3012_v32, %v1066_v31  ;;  %v1080_v2 = vshll.u32 %v3015_v38, %v1065_v51 }
 0x14f   : > { %v928_v5 = vmul.f32 %v927_v53, %v925_v39  ;;  %vm733_vm10 = vcmp.lt.s32.totalorder %v4067_v20, 2  ;;  %v1072_v6 = vshrl.u32 %v3013_v34, %v1066_v31  ;;  %v1075_v42 = vshrl.u32 %v3014_v36, %v1066_v31 }
 0x150   : > { %v1078_v47 = vshrl.u32 %v3015_v38, %v1066_v31  ;;  %v4102_v12 = vand.u32 3, %v1975_v11  ;;  %v4104_v57 = vshrl.u32 %v1215_v24, 30  ;;  %v1081_v32 = vshrl.u32 %v3016_v46, %v1066_v31 }
 0x151   : > { %v929_v48 = vxor.u32 2147483648, %v928_v5  ;;  %v735_v17 = vxor.u32 2147483648, %v2834_v15  ;;  %v738_v50 = vxor.u32 2147483648, %v2832_v41  ;;  %vm731_vm11 = vweird.f32 %v3710_v28 }
 0x152   : > { %v1079_v52 = vor.u32 %v1078_v47, %v1077_v63  ;;  %v1217_v34 = vshll.u32 %v4104_v57, 30  ;;  %v1070_v36 = vor.u32 %v1069_v59, %v1068_v4  ;;  %v1073_v7 = vor.u32 %v1072_v6, %v1071_v9 }
 0x153   : > { %v930_v26 = vsel %vm847_vm12, %v929_v48, %v928_v5  ;;  %vm943_vm12 = vcmp.eq.s32.totalorder %v4081_v22, 2  ;;  %v1076_v38 = vor.u32 %v1075_v42, %v1074_v29  ;;  %vm940_vm1 = vcmp.eq.s32.totalorder %v4081_v22, 0 }
 0x154   : > { %v933_v14 = vsel %vm4054_vm6, %v3809_v19, %v930_v26  ;;  %v1067_v49 = vshrl.u32 %v3011_v30, %v1066_v31  ;;  %v1082_v23 = vor.u32 %v1081_v32, %v1080_v2  ;;  %vm1083_vm2 = vcmp.lt.s32.totalorder %v4084_v10, 1 }
 0x155   : > { %2835 = vcosq.f32 %v933_v14  ;;  %vm1086_vm3 = vcmp.lt.s32.totalorder %v4084_v10, 4  ;;  %vm939_vm4 = vcmp.lt.s32.totalorder %v4081_v22, 2  ;;  %v4115_v46 = vsub.s32 %v1214_v55, %v1217_v34 }
 0x156   : > { %2837 = vsinq.f32 %v933_v14  ;;  %vm1085_vm5 = vcmp.lt.s32.totalorder %v4084_v10, 3  ;;  %v1088_v58 = vsel %vm1086_vm3, %v1076_v38, 2102212464  ;;  %v4120_v61 = vshll.u32 %v1059_v35, 8 }
 0x157   : > { %vm937_vm6 = vweird.f32 %v3809_v19  ;;  %v1772_v30 = vsel %vm1770_vm14, %v2832_v41, %v735_v17  ;;  %v1775_v54 = vsel %vm1773_vm13, %v738_v50, %v2834_v15  ;;  %v739_v43 = vsel %vm737_vm15, %v738_v50, %v2834_v15 }
 0x158   : > { %v1092_v56 = vsel %vm1086_vm3, %v1079_v52, 920167782  ;;  %v736_v45 = vsel %vm734_vm9, %v2832_v41, %v735_v17  ;;  %v1220_v62 = vsub.s32 0, %v4115_v46  ;;  %vm1084_vm7 = vcmp.lt.s32.totalorder %v4084_v10, 2 }
 0x159   : > { %v1091_v44 = vsel %vm1083_vm2, %v1070_v36, %v1073_v7  ;;  %v1087_v25 = vsel %vm1083_vm2, %v1067_v49, %v1070_v36  ;;  %v1089_v53 = vsel %vm1085_vm5, %v1073_v7, %v1088_v58  ;;  %v1093_v3 = vsel %vm1085_vm5, %v1076_v38, %v1092_v56 }
 0x15a   : > { %v1096_v60 = vsel %vm1086_vm3, %v1082_v23, 1326507024  ;;  %vm1977_vm8 = vcmp.lt.s32.totalorder %v4102_v12, 2  ;;  %vm1978_vm14 = vcmp.eq.s32.totalorder %v4102_v12, 0  ;;  %v2614_v39 = vmin.u32 %v1220_v62, %v4115_v46 }
 0x15b   : > { %v1095_v1 = vsel %vm1083_vm2, %v1073_v7, %v1076_v38  ;;  %v1776_v16 = vsel %vm1769_vm0, %v1772_v30, %v1775_v54  ;;  %vm1981_vm13 = vcmp.eq.s32.totalorder %v4102_v12, 2  ;;  %v1094_v18 = vsel %vm1084_vm7, %v1091_v44, %v1093_v3 }
 0x15c   : > { %v1097_v5 = vsel %vm1085_vm5, %v1079_v52, %v1096_v60  ;;  %v740_v11 = vsel %vm733_vm10, %v736_v45, %v739_v43  ;;  %v1210_v37 = vadd.s32 %v4060_v33, %v4050_v40  ;;  %v1222_v35 = vclz %v2614_v39 }
 0x15d   : > { %v1090_v8 = vsel %vm1084_vm7, %v1087_v25, %v1089_v53  ;;  %v1098_v31 = vsel %vm1084_vm7, %v1095_v1, %v1097_v5  ;;  %v4166_v41 = vmul.u32.u64.low %v4120_v61, %v1094_v18  ;;  %v4167_v4 = vmul.u32.u64.high %v4120_v61, %v1094_v18, %v4166_v41 }
 0x15e   : > { %v2615_v29 = vadd.s32 4294967294, %v1222_v35  ;;  %v4170_v20 = vmul.u32.u64.low %v4120_v61, %v1098_v31  ;;  %v4171_v63 = vmul.u32.u64.high %v4120_v61, %v1098_v31, %v4170_v20  ;;  %v1777_v40 = vsel %vm731_vm11, nan, %v1776_v16 }
 0x15f   : > { %v2836_v51 = vpop.eup %2835  ;;  %v741_v10 = vsel %vm731_vm11, nan, %v740_v11  ;;  %v1106_v59 = vmul.u32 %v4120_v61, %v1090_v8  ;;  %v1109_v6 = vadd.s32 1, %v4167_v4  ;;  %v1240_v30 = vsub.s32 4, %v4104_v57 }
 0x160   : > { %v2838_v48 = vpop.eup %2837  ;;  %v944_v55 = vxor.u32 2147483648, %v2836_v51  ;;  %vm2616_vm15 = vcmp.lt.s32.totalorder %v2615_v29, 0  ;;  %vm1108_vm9 = vc.u32 %v4171_v63, %v4166_v41  ;;  %vm1156_vm0 = vcmp.lt.s32.totalorder %v3872_v13, 0 }
 0x161   : > { %v941_v9 = vxor.u32 2147483648, %v2838_v48  ;;  %v1225_v28 = vsel %vm2616_vm15, 0, %v2615_v29  ;;  %v1110_v36 = vsel %vm1108_vm9, %v1109_v6, %v4167_v4  ;;  %vm1155_vm10 = vcmp.le.f32.partialorder %v1154_v27, 0.7853982 }
 0x162   : > { %v1983_v33 = vsel %vm1981_vm13, %v944_v55, %v2838_v48  ;;  %v945_v15 = vsel %vm943_vm12, %v944_v55, %v2838_v48  ;;  %v1226_v32 = vsub.s32 32, %v1225_v28  ;;  %v1227_v17 = vshll.u32 %v4115_v46, %v1225_v28 }
 0x163   : > { %v1980_v26 = vsel %vm1978_vm14, %v2836_v51, %v941_v9  ;;  %v942_v24 = vsel %vm940_vm1, %v2836_v51, %v941_v9  ;;  %v1230_v34 = vsub.s32 4294967266, %v1225_v28  ;;  %v1111_v38 = vadd.s32 %v1110_v36, %v1106_v59 }
 0x164   : > { %v1984_v2 = vsel %vm1977_vm8, %v1980_v26, %v1983_v33  ;;  %v946_v14 = vsel %vm939_vm4, %v942_v24, %v945_v15  ;;  %v1228_v12 = vshrl.u32 %v1210_v37, %v1226_v32  ;;  %v1241_v62 = vsel %vm1156_vm0, %v1240_v30, %v4104_v57 }
 0x165   : > { %v1985_v42 = vsel %vm937_vm6, nan, %v1984_v2  ;;  %v947_v47 = vsel %vm937_vm6, nan, %v946_v14  ;;  %v1231_v22 = vadd.s32 127, %v1230_v34  ;;  %v1112_v23 = vadd.s32 536870912, %v1111_v38 }
 0x166   : > { %v2676_v50 = vpack.c.bf16 %v1985_v42, %v1777_v40  ;;  %v2684_v52 = vpack.c.bf16 %v947_v47, %v741_v10  ;;  %v1229_v7 = vor.u32 %v1228_v12, %v1227_v17  ;;  %v1243_v3 = vsel %vm1155_vm10, 0, %v1241_v62 }
 0x167   : > { %v1232_v49 = vshll.u32 %v1231_v22, 23  ;;  %v4198_v61 = vshrl.u32 %v1112_v23, 30  ;;  %v2287_v1 = vadd.s32 3, %v1243_v3  ;;  %v1107_v18 = vadd.s32 %v4166_v41, %v4171_v63 }
 0x168   : > { %2677 = vmatpush1.bf16.msra.mxu1 %v2676_v50  ;;  %2685 = vmatpush1.bf16.msra.mxu0 %v2684_v52  ;;  %v1236_v58 = vcvt.s32.f32 %v1229_v7  ;;  %v1247_v51 = vand.u32 3, %v1243_v3  ;;  %vm1246_vm4 = vweird.f32 %v3872_v13  ;;  %vm2302_vm7 = vcmask 1043456  }
 0x169   : > { %v1233_v19 = vor.u32 4788187, %v1232_v49  ;;  %v1114_v54 = vshll.u32 %v4198_v61, 30  ;;  %v2288_v5 = vand.u32 3, %v2287_v1  ;;  %v1137_v59 = vsub.s32 4, %v4198_v61 }
 0x16a   : > { %vm1249_vm1 = vcmp.eq.s32.totalorder %v1247_v51, 0  ;;  %vm1252_vm2 = vcmp.eq.s32.totalorder %v1247_v51, 2  ;;  %vm1248_vm6 = vcmp.lt.s32.totalorder %v1247_v51, 2  ;;  %vm1053_vm8 = vcmp.lt.s32.totalorder %v4004_v21, 0 }
 0x16b   : > { %v1234_v46 = vand.u32 2147483647, %v1233_v19  ;;  %v1115_v56 = vsub.s32 %v1111_v38, %v1114_v54  ;;  %vm2293_vm12 = vcmp.eq.s32.totalorder %v2288_v5, 2  ;;  %vm2290_vm3 = vcmp.eq.s32.totalorder %v2288_v5, 0 }
 0x16c   : > { %vm2289_vm5 = vcmp.lt.s32.totalorder %v2288_v5, 2  ;;  %vm1052_vm14 = vcmp.le.f32.partialorder %v1051_v0, 0.7853982  ;;  %v1138_v42 = vsel %vm1053_vm8, %v1137_v59, %v4198_v61  ;;  %v226_v61 = vld [vmem:[#allocation5] sm:$0xff] }
 0x16d   : > { %v1237_v43 = vmul.f32 %v1236_v58, %v1234_v46  ;;  %v1117_v44 = vsub.s32 0, %v1115_v56  ;;  %v1140_v17 = vsel %vm1052_vm14, 0, %v1138_v42  ;;  %v1257_v58 = vld [vmem:[#allocation7] sm:$0xff] }
 0x16e   : > { %v1144_v52 = vand.u32 3, %v1140_v17 }
 0x16f   : > { %v1238_v45 = vxor.u32 2147483648, %v1237_v43  ;;  %v2610_v60 = vmin.u32 %v1117_v44, %v1115_v56 }
 0x170   : > { %vm1149_vm15 = vcmp.eq.s32.totalorder %v1144_v52, 2 }
 0x171   : > { %v1239_v25 = vsel %vm1156_vm0, %v1238_v45, %v1237_v43  ;;  %v1119_v39 = vclz %v2610_v60  ;;  %vm1146_vm0 = vcmp.eq.s32.totalorder %v1144_v52, 0 }
 0x172   : > { %v1242_v53 = vsel %vm1155_vm10, %v3872_v13, %v1239_v25  ;;  %v2183_v13 = vadd.s32 3, %v1140_v17 }
 0x173   : > { %2839 = vcosq.f32 %v1242_v53  ;;  %v2611_v16 = vadd.s32 4294967294, %v1119_v39 }
 0x174   : > { %2841 = vsinq.f32 %v1242_v53  ;;  %v2184_v50 = vand.u32 3, %v2183_v13 }
 0x175   : > { %vm2612_vm11 = vcmp.lt.s32.totalorder %v2611_v16, 0 }
 0x176   : > { %v1122_v27 = vsel %vm2612_vm11, 0, %v2611_v16  ;;  %vm2189_vm13 = vcmp.eq.s32.totalorder %v2184_v50, 2  ;;  %vm2186_vm9 = vcmp.eq.s32.totalorder %v2184_v50, 0  ;;  %vm2185_vm10 = vcmp.lt.s32.totalorder %v2184_v50, 2 }
 0x177   : > { %v1123_v11 = vsub.s32 32, %v1122_v27  ;;  %v1124_v37 = vshll.u32 %v1115_v56, %v1122_v27  ;;  %v1127_v57 = vsub.s32 4294967266, %v1122_v27  ;;  %vm1145_vm11 = vcmp.lt.s32.totalorder %v1144_v52, 2 }
 0x179   : > { %v1125_v35 = vshrl.u32 %v1107_v18, %v1123_v11  ;;  %v1128_v8 = vadd.s32 127, %v1127_v57 }
 0x17b   : > { %v1126_v4 = vor.u32 %v1125_v35, %v1124_v37  ;;  %v1129_v9 = vshll.u32 %v1128_v8, 23 }
 0x17d   : > { %v2840_v48 = vpop.eup %2839  ;;  %v1130_v63 = vor.u32 4788187, %v1129_v9  ;;  %v1133_v40 = vcvt.s32.f32 %v1126_v4 }
 0x17e   : > { %v2842_v55 = vpop.eup %2841  ;;  %v1253_v31 = vxor.u32 2147483648, %v2840_v48 }
 0x17f   : > { %v1250_v41 = vxor.u32 2147483648, %v2842_v55  ;;  %v1131_v24 = vand.u32 2147483647, %v1130_v63 }
 0x180   : > { %v2295_v29 = vsel %vm2293_vm12, %v1253_v31, %v2842_v55  ;;  %v1254_v20 = vsel %vm1252_vm2, %v1253_v31, %v2842_v55  ;;  %vm1143_vm12 = vweird.f32 %v4004_v21 }
 0x181   : > { %v2292_v33 = vsel %vm2290_vm3, %v2840_v48, %v1250_v41  ;;  %v1251_v10 = vsel %vm1249_vm1, %v2840_v48, %v1250_v41  ;;  %v1134_v28 = vmul.f32 %v1133_v40, %v1131_v24  ;;  %vm2298_vm1 = vcmask 293888  }
 0x182   : > { %v2296_v15 = vsel %vm2289_vm5, %v2292_v33, %v2295_v29  ;;  %v1255_v26 = vsel %vm1248_vm6, %v1251_v10, %v1254_v20 }
 0x183   : > { %v2297_v2 = vsel %vm1246_vm4, nan, %v2296_v15  ;;  %v1256_v14 = vsel %vm1246_vm4, nan, %v1255_v26  ;;  %v1135_v6 = vxor.u32 2147483648, %v1134_v28 }
 0x184   : > { %2657 = vmatprep.subr.msk.mxu1 %vm2302_vm7, %v2297_v2  ;;  %2660 = vmatprep.subr.msk.mxu0 %vm2302_vm7, %v1256_v14 }
 0x185   : > { %v1136_v47 = vsel %vm1053_vm8, %v1135_v6, %v1134_v28 }
 0x186   : > { %v1139_v32 = vsel %vm1052_vm14, %v4004_v21, %v1136_v47 }
 0x187   : > { %2843 = vcosq.f32 %v1139_v32 }
 0x188   : > { %2845 = vsinq.f32 %v1139_v32 }
 0x191   : > { %v2844_v34 = vpop.eup %2843 }
 0x192   : > { %v2846_v12 = vpop.eup %2845  ;;  %v1150_v22 = vxor.u32 2147483648, %v2844_v34 }
 0x193   : > { %v1147_v0 = vxor.u32 2147483648, %v2846_v12 }
 0x194   : > { %v2191_v36 = vsel %vm2189_vm13, %v1150_v22, %v2846_v12  ;;  %v1151_v7 = vsel %vm1149_vm15, %v1150_v22, %v2846_v12 }
 0x195   : > { %v2188_v38 = vsel %vm2186_vm9, %v2844_v34, %v1147_v0  ;;  %v1148_v49 = vsel %vm1146_vm0, %v2844_v34, %v1147_v0 }
 0x196   : > { %v2192_v23 = vsel %vm2185_vm10, %v2188_v38, %v2191_v36  ;;  %v1152_v19 = vsel %vm1145_vm11, %v1148_v49, %v1151_v7 }
 0x197   : > { %v2193_v46 = vsel %vm1143_vm12, nan, %v2192_v23  ;;  %v1153_v30 = vsel %vm1143_vm12, nan, %v1152_v19 }
 0x198   : > { %2658 = vmatpush1.msk.msra.mxu1 %vm2302_vm7, %v2193_v46  ;;  %2661 = vmatpush1.msk.msra.mxu0 %vm2302_vm7, %v1153_v30 }
 0x199   : > { %2659 = vmatmul.mubr.msk.f32.vlgmr.msra.gmra.mrb[0].mxu1 %vm2298_vm1, %v1257_v58  ;;  %2662 = vmatmul.mubr.msk.f32.vlgmr.msra.gmra.mrb[0].mxu0 %vm2298_vm1, %v226_v61 }
 0x26c   : > { %v2375_v21 = vpop.f32.mrb[0].mxu1  ;;  %v2455_v54 = vpop.f32.mrb[0].mxu0 }
 0x26d   : > { %v2456_v43 = vadd.f32 %v2455_v54, %v2375_v21  ;;  %v2377_v56 = vpop.f32.mrb[1].mxu1  ;;  %v2457_v45 = vpop.f32.mrb[1].mxu0 }
 0x26e   : > { %v2458_v62 = vadd.f32 %v2457_v45, %v2377_v56 }
 0x26f   : > { %2460 = vst [vmem:[%s213_s30] sm:$0xff] %v2456_v43 }
 0x270   : > { %2461 = vst [vmem:[%s213_s30 + $0x8] sm:$0xff] %v2458_v62 }
 0x271   : > { %2946 = shalt.err (!%p2943_p6)
}
 0x272   : > { %s2947_s6 = scalar_lea.hbm %s4230_s19, 256  ;;  %s2951_s5 = scalar_lea.hbm %s4277_s3, 512 }
 0x273   : > { %p2948_p12 = scmp.ne.s32.totalorder %s4230_s19, %s2947_s6  ;;  %p2952_p11 = scmp.lt.u32.totalorder %s4230_s19, %s4277_s3 }
 0x274   : > { %p2953_p7 = scmp.lt.u32.totalorder %s2951_s5, %s2947_s6  ;;  %p2955_p8 = scmp.lt.u32.totalorder %s2947_s6, %s4230_s19 }
 0x275   : > { %p2949_p13 = pnand %p2948_p12, %p4312_p4 }
 0x276   : > { %p2954_p3 = por %p2953_p7, %p2952_p11 }
 0x277   : > { %p2950_p1 = pneg %p2949_p13 }
 0x278   : > { %p2956_p5 = por %p2955_p8, %p2954_p3 }
 0x27a   : > { %p2957_p10 = pnand %p2956_p5, %p2950_p1 }
 0x27c   : > { %2960 = shalt.err (!%p2957_p10)
}
 0x27d   : > { %2740 = dma.vmem_to_hbm [thread:$0]  (%p4312_p4), %s4232_s7, 256, %s4230_s19, %s2463_s16  }
 0x27e PF: > { %s2489_s17 = sand.u32 1, %s2991_s12   ;;  %p4313_p2 = scmp.ne.s32.totalorder %s4286_s25, 0 }
 0x27f   : > { %p4314_p0 = scmp.ge.s32.totalorder %s3003_s15, 2  ;;  %s2490_s23 = scalar_lea.sflag [#allocation4], %s2489_s17 }
 0x281   : > { %p2754_p9 = pnand %p4314_p0, %p4313_p2 }
 0x283   : > { %2986 = dma.done.wait (!%p2754_p9), %s2490_s23, 256  }
 0x284   : > { %2988 = vsyncadd (!%p2754_p9), %s2490_s23, 4294967040  ;;  %p17_p6 = scmp.ge.s32.totalorder %s3064_s18, 4   ;;  %s4315_s12 = smov %s2995_s13 }
 0x285   : > { %s4316_s13 = smov %s2999_s14  ;;  %s4317_s14 = smov %s3076_s21 }
 0x286   : > { %s4318_s15 = smov %s3064_s18  ;;  %19 = sbr.rel (!%p17_p6) target bundleno = 6 (0x6), region = 85 }
 0x28d   :  { %2495 = vsyncpa [#allocation3], 1 }
 0x28e   :  { %2497 = vsyncpa [#allocation3 + $0x1], 1 }
 0x28f   :  { %2498 = vsyncpa [#allocation6], 1 }
 0x290   :  { %2499 = vsyncpa [#allocation4], 1 }
 0x291   :  { %2501 = vsyncpa [#allocation4 + $0x1], 1 }

</bundles_post_ra>
